<compile_context>
chip_gen: v7x
topology: tpu7x:2x2x1
jax: 0.10.0
libtpu: 0.0.40
codegen_flags: <defaults>
</compile_context>

<pallas_src>
import functools

import jax
import jax.numpy as jnp
from jax import lax
from jax.experimental import pallas as pl
from jax.experimental.pallas import tpu as pltpu


# ----------------------------------------------------------------------------
# Fused kernel: input projection + batched LSTM recurrence + FC epilogue.
# ----------------------------------------------------------------------------
def _net_fused_kernel(x_ref, wih_ref, whh_ref, b_ref, wfc_ref, bfc_ref,
                      out_ref, xg_ref, *, num_streams, seq_len, s_pad):
    """x_ref:   [T*S_pad, E]      bf16  (time-major: row = t*S_pad + s)
       wih_ref: [E, 4H]           bf16
       whh_ref: [H, 4H]           bf16
       b_ref:   [1, 4H]           f32   (b_ih + b_hh)
       wfc_ref: [S_pad, H, O_pad] f32   (zero-padded W_fc^T, stream-major)
       bfc_ref: [1, O_pad]        f32
       out_ref: [1, O_pad]        f32   (lane-dense logits slab)
       xg_ref:  VMEM scratch [T*S_pad, 4H] f32 (precomputed input gates)."""
    H = whh_ref.shape[0]

    # 1) Input projection for every (t, s) at once on the MXU, bias folded in.
    xg_ref[...] = (
        jnp.dot(x_ref[...], wih_ref[...], preferred_element_type=jnp.float32)
        + b_ref[...]
    )

    # 2) Recurrence over time; all streams batched along the sublane axis.
    def step(t, carry):
        h, c = carry  # each [S_pad, H] f32
        row0 = pl.multiple_of(t * s_pad, s_pad)
        gates = xg_ref[pl.ds(row0, s_pad), :] + jnp.dot(
            h.astype(whh_ref.dtype), whh_ref[...],
            preferred_element_type=jnp.float32,
        )  # [S_pad, 4H] f32
        i = jax.nn.sigmoid(gates[:, 0:H])
        f = jax.nn.sigmoid(gates[:, H:2 * H])
        g = jnp.tanh(gates[:, 2 * H:3 * H])
        o = jax.nn.sigmoid(gates[:, 3 * H:4 * H])
        c_new = f * c + i * g
        h_new = o * jnp.tanh(c_new)
        return h_new, c_new

    h0 = jnp.zeros((s_pad, H), jnp.float32)
    c0 = jnp.zeros((s_pad, H), jnp.float32)
    _, c_fin = lax.fori_loop(0, seq_len, step, (h0, c0), unroll=True)

    # 3) Fused FC epilogue: logits = stack(cell_states).view(-1) @ W_fc^T + b.
    #    (padded streams are excluded; their weight rows are zero anyway)
    acc = bfc_ref[...]  # [1, O_pad] f32
    for s in range(num_streams):
        acc = acc + jnp.dot(c_fin[s:s + 1, :], wfc_ref[s],
                            preferred_element_type=jnp.float32)
    out_ref[...] = acc


def net_forward(x2d, w_ih_t, w_hh_t, bias, w_fc_r, b_fc_pad,
                *, num_streams, seq_len, s_pad):
    """x2d: [T*S_pad, E] bf16 -> logits slab [1, O_pad] f32."""
    TS, E = x2d.shape
    H = w_hh_t.shape[0]
    S_pad, _, O_pad = w_fc_r.shape
    kernel = functools.partial(
        _net_fused_kernel,
        num_streams=num_streams, seq_len=seq_len, s_pad=s_pad)
    return pl.pallas_call(
        kernel,
        out_shape=jax.ShapeDtypeStruct((1, O_pad), jnp.float32),
        grid=(1,),
        in_specs=[
            pl.BlockSpec((TS, E), lambda i: (0, 0)),
            pl.BlockSpec((E, 4 * H), lambda i: (0, 0)),
            pl.BlockSpec((H, 4 * H), lambda i: (0, 0)),
            pl.BlockSpec((1, 4 * H), lambda i: (0, 0)),
            pl.BlockSpec((S_pad, H, O_pad), lambda i: (0, 0, 0)),
            pl.BlockSpec((1, O_pad), lambda i: (0, 0)),
        ],
        out_specs=pl.BlockSpec((1, O_pad), lambda i: (0, 0)),
        scratch_shapes=[pltpu.VMEM((TS, 4 * H), jnp.float32)],
        compiler_params=pltpu.CompilerParams(
            dimension_semantics=("arbitrary",)),
    )(x2d, w_ih_t, w_hh_t, bias, w_fc_r, b_fc_pad)


# ----------------------------------------------------------------------------
# Net (LSTM + FC), deterministic synthetic weights (PyTorch-style init).
# ----------------------------------------------------------------------------
class PallasNet:
    def __init__(self, rnn_size, output_size, embedding_size, key):
        H, E, O = rnn_size, embedding_size, output_size
        S = O  # fc expects output_size * rnn_size features -> S streams == O
        S_pad = ((S + 7) // 8) * 8
        O_pad = ((O + 127) // 128) * 128

        k1, k2, k3, k4, k5, k6 = jax.random.split(key, 6)
        klstm = 1.0 / jnp.sqrt(jnp.float32(H))
        # PyTorch LSTM layout: W_ih [4H, E], W_hh [4H, H]; stored transposed,
        # bf16 for the MXU (accumulation stays f32 in-kernel).
        self.w_ih_t = jax.random.uniform(
            k1, (E, 4 * H), jnp.float32, -klstm, klstm).astype(jnp.bfloat16)
        self.w_hh_t = jax.random.uniform(
            k2, (H, 4 * H), jnp.float32, -klstm, klstm).astype(jnp.bfloat16)
        b_ih = jax.random.uniform(k3, (4 * H,), jnp.float32, -klstm, klstm)
        b_hh = jax.random.uniform(k4, (4 * H,), jnp.float32, -klstm, klstm)
        self.bias = (b_ih + b_hh).reshape(1, 4 * H)

        kfc = 1.0 / jnp.sqrt(jnp.float32(O * H))
        # nn.Linear: W_fc [O, O*H], b_fc [O].
        w_fc = jax.random.uniform(k5, (O, O * H), jnp.float32, -kfc, kfc)
        b_fc = jax.random.uniform(k6, (O,), jnp.float32, -kfc, kfc)
        # W_fc^T [S*H, O] -> stream-major [S, H, O], zero-padded to
        # [S_pad, H, O_pad] so the fused epilogue stays lane-dense.
        w_fc_r = jnp.zeros((S_pad, H, O_pad), jnp.float32)
        w_fc_r = w_fc_r.at[:S, :, :O].set(w_fc.T.reshape(S, H, O))
        self.w_fc_r = w_fc_r
        self.b_fc_pad = jnp.zeros((1, O_pad), jnp.float32).at[0, :O].set(b_fc)

        self.H, self.O, self.S, self.S_pad, self.O_pad = H, O, S, S_pad, O_pad

    @functools.partial(jax.jit, static_argnums=0)
    def __call__(self, embedded_streams):
        # embedded_streams: [S, T, E]; S must equal output_size (as in the
        # original model, where fc expects output_size * rnn_size features).
        S, T, E = embedded_streams.shape
        assert S == self.O, "number of streams must equal output_size"
        # Pad streams to a full sublane tile and lay out time-major so each
        # timestep reads a sublane-dense [S_pad, 4H] gate slab.
        x_pad = jnp.zeros((self.S_pad, T, E), jnp.bfloat16)
        x_pad = x_pad.at[:S, :, :].set(embedded_streams.astype(jnp.bfloat16))
        x2d = x_pad.transpose(1, 0, 2).reshape(T * self.S_pad, E)
        out = net_forward(
            x2d, self.w_ih_t, self.w_hh_t, self.bias,
            self.w_fc_r, self.b_fc_pad,
            num_streams=S, seq_len=T, s_pad=self.S_pad)  # [1, O_pad]
        return out[0, :self.O]


if __name__ == "__main__":
    S, T, E, H, O = 7, 8, 256, 128, 7  # streams, seq, embed, rnn_size, output
    key = jax.random.PRNGKey(0)
    k_inp, k_par = jax.random.split(key)

    # Synthetic "already conv-embedded" streams (stand-in for resnet18 output).
    embedded_streams = jax.random.normal(k_inp, (S, T, E), jnp.float32)

    net = PallasNet(rnn_size=H, output_size=O, embedding_size=E, key=k_par)
    logits = net(embedded_streams)
    jax.block_until_ready(logits)
    assert logits.shape == (O,) and logits.dtype == jnp.float32
    assert bool(jnp.all(jnp.isfinite(logits)))
    print("KERNEL_OK")
</pallas_src>

<mosaic_0001>
module attributes {stable_mosaic.version = 11 : i64} {
  func.func @_net_fused_kernel(%arg0: i32, %arg1: memref<64x256xbf16, #tpu.memory_space<vmem>>, %arg2: memref<256x512xbf16, #tpu.memory_space<vmem>>, %arg3: memref<128x512xbf16, #tpu.memory_space<vmem>>, %arg4: memref<1x512xf32, #tpu.memory_space<vmem>>, %arg5: memref<8x128x128xf32, #tpu.memory_space<vmem>>, %arg6: memref<1x128xf32, #tpu.memory_space<vmem>>, %arg7: memref<1x128xf32, #tpu.memory_space<vmem>>, %arg8: memref<64x512xf32, #tpu.memory_space<vmem>>) attributes {dimension_semantics = [#tpu.dimension_semantics<arbitrary>], iteration_bounds = array<i64: 1>, scalar_prefetch = 0 : i64, scratch_operands = 1 : i64, tpu.core_type = #tpu.core_type<tc>, window_params = [{pipeline_mode = #tpu.pipeline_mode<synchronous>, transform_indices = @transform_0, window_bounds = array<i64: 64, 256>}, {pipeline_mode = #tpu.pipeline_mode<synchronous>, transform_indices = @transform_1, window_bounds = array<i64: 256, 512>}, {pipeline_mode = #tpu.pipeline_mode<synchronous>, transform_indices = @transform_2, window_bounds = array<i64: 128, 512>}, {pipeline_mode = #tpu.pipeline_mode<synchronous>, transform_indices = @transform_3, window_bounds = array<i64: 1, 512>}, {pipeline_mode = #tpu.pipeline_mode<synchronous>, transform_indices = @transform_4, window_bounds = array<i64: 8, 128, 128>}, {pipeline_mode = #tpu.pipeline_mode<synchronous>, transform_indices = @transform_5, window_bounds = array<i64: 1, 128>}, {pipeline_mode = #tpu.pipeline_mode<synchronous>, transform_indices = @transform_6, window_bounds = array<i64: 1, 128>}]} {
    %c0 = arith.constant 0 : index
    %c0_0 = arith.constant 0 : index
    %0 = vector.load %arg1[%c0, %c0_0] : memref<64x256xbf16, #tpu.memory_space<vmem>>, vector<64x256xbf16>
    %c0_1 = arith.constant 0 : index
    %c0_2 = arith.constant 0 : index
    %1 = vector.load %arg2[%c0_1, %c0_2] : memref<256x512xbf16, #tpu.memory_space<vmem>>, vector<256x512xbf16>
    %cst = arith.constant dense<0.000000e+00> : vector<64x512xf32>
    %2 = tpu.matmul %0, %1, %cst {dimension_numbers = #tpu.dot_dimension_numbers<[1], [0], [0], [1], [0, 0, 1, 1], [], []>} : vector<64x256xbf16>, vector<256x512xbf16>, vector<64x512xf32> -> vector<64x512xf32>
    %c0_3 = arith.constant 0 : index
    %c0_4 = arith.constant 0 : index
    %3 = vector.load %arg4[%c0_3, %c0_4] : memref<1x512xf32, #tpu.memory_space<vmem>>, vector<1x512xf32>
    %4 = vector.broadcast %3 : vector<1x512xf32> to vector<64x512xf32>
    %5 = arith.addf %2, %4 : vector<64x512xf32>
    %c0_5 = arith.constant 0 : index
    %c0_6 = arith.constant 0 : index
    %6 = vector.load %arg8[%c0_5, %c0_6] : memref<64x512xf32, #tpu.memory_space<vmem>>, vector<64x512xf32>
    tpu.vector_store %arg8[%c0_5, %c0_6], %5 {strides = array<i32>} : memref<64x512xf32, #tpu.memory_space<vmem>>, vector<64x512xf32>,
    %cst_7 = arith.constant 0.000000e+00 : f32
    %7 = vector.broadcast %cst_7 : f32 to vector<8x128xf32>
    %cst_8 = arith.constant 0.000000e+00 : f32
    %8 = vector.broadcast %cst_8 : f32 to vector<8x128xf32>
    %c0_i32 = arith.constant 0 : i32
    %c8_i32 = arith.constant 8 : i32
    %9 = arith.muli %c0_i32, %c8_i32 : i32
    %10 = tpu.assume_multiple %9, 8 : i32
    %11 = arith.index_cast %10 : i32 to index
    %c0_9 = arith.constant 0 : index
    %12 = vector.load %arg8[%11, %c0_9] : memref<64x512xf32, #tpu.memory_space<vmem>>, vector<8x512xf32>
    %13 = arith.truncf %7 : vector<8x128xf32> to vector<8x128xbf16>
    %c0_10 = arith.constant 0 : index
    %c0_11 = arith.constant 0 : index
    %14 = vector.load %arg3[%c0_10, %c0_11] : memref<128x512xbf16, #tpu.memory_space<vmem>>, vector<128x512xbf16>
    %cst_12 = arith.constant dense<0.000000e+00> : vector<8x512xf32>
    %15 = tpu.matmul %13, %14, %cst_12 {dimension_numbers = #tpu.dot_dimension_numbers<[1], [0], [0], [1], [0, 0, 1, 1], [], []>} : vector<8x128xbf16>, vector<128x512xbf16>, vector<8x512xf32> -> vector<8x512xf32>
    %16 = arith.addf %12, %15 : vector<8x512xf32>
    %17 = vector.extract_strided_slice %16 {offsets = [0, 0], sizes = [8, 128], strides = [1, 1]} : vector<8x512xf32> to vector<8x128xf32>
    %18 = arith.negf %17 : vector<8x128xf32>
    %19 = math.exp %18 : vector<8x128xf32>
    %cst_13 = arith.constant 1.000000e+00 : f32
    %20 = vector.broadcast %cst_13 : f32 to vector<8x128xf32>
    %21 = arith.addf %20, %19 : vector<8x128xf32>
    %22 = arith.divf %20, %21 : vector<8x128xf32>
    %23 = vector.extract_strided_slice %16 {offsets = [0, 128], sizes = [8, 128], strides = [1, 1]} : vector<8x512xf32> to vector<8x128xf32>
    %24 = arith.negf %23 : vector<8x128xf32>
    %25 = math.exp %24 : vector<8x128xf32>
    %cst_14 = arith.constant 1.000000e+00 : f32
    %26 = vector.broadcast %cst_14 : f32 to vector<8x128xf32>
    %27 = arith.addf %26, %25 : vector<8x128xf32>
    %28 = arith.divf %26, %27 : vector<8x128xf32>
    %29 = vector.extract_strided_slice %16 {offsets = [0, 256], sizes = [8, 128], strides = [1, 1]} : vector<8x512xf32> to vector<8x128xf32>
    %30 = math.tanh %29 : vector<8x128xf32>
    %31 = vector.extract_strided_slice %16 {offsets = [0, 384], sizes = [8, 128], strides = [1, 1]} : vector<8x512xf32> to vector<8x128xf32>
    %32 = arith.negf %31 : vector<8x128xf32>
    %33 = math.exp %32 : vector<8x128xf32>
    %cst_15 = arith.constant 1.000000e+00 : f32
    %34 = vector.broadcast %cst_15 : f32 to vector<8x128xf32>
    %35 = arith.addf %34, %33 : vector<8x128xf32>
    %36 = arith.divf %34, %35 : vector<8x128xf32>
    %37 = arith.mulf %28, %8 : vector<8x128xf32>
    %38 = arith.mulf %22, %30 : vector<8x128xf32>
    %39 = arith.addf %37, %38 : vector<8x128xf32>
    %40 = math.tanh %39 : vector<8x128xf32>
    %41 = arith.mulf %36, %40 : vector<8x128xf32>
    %c1_i32 = arith.constant 1 : i32
    %c8_i32_16 = arith.constant 8 : i32
    %42 = arith.muli %c1_i32, %c8_i32_16 : i32
    %43 = tpu.assume_multiple %42, 8 : i32
    %44 = arith.index_cast %43 : i32 to index
    %c0_17 = arith.constant 0 : index
    %45 = vector.load %arg8[%44, %c0_17] : memref<64x512xf32, #tpu.memory_space<vmem>>, vector<8x512xf32>
    %46 = arith.truncf %41 : vector<8x128xf32> to vector<8x128xbf16>
    %c0_18 = arith.constant 0 : index
    %c0_19 = arith.constant 0 : index
    %47 = vector.load %arg3[%c0_18, %c0_19] : memref<128x512xbf16, #tpu.memory_space<vmem>>, vector<128x512xbf16>
    %cst_20 = arith.constant dense<0.000000e+00> : vector<8x512xf32>
    %48 = tpu.matmul %46, %47, %cst_20 {dimension_numbers = #tpu.dot_dimension_numbers<[1], [0], [0], [1], [0, 0, 1, 1], [], []>} : vector<8x128xbf16>, vector<128x512xbf16>, vector<8x512xf32> -> vector<8x512xf32>
    %49 = arith.addf %45, %48 : vector<8x512xf32>
    %50 = vector.extract_strided_slice %49 {offsets = [0, 0], sizes = [8, 128], strides = [1, 1]} : vector<8x512xf32> to vector<8x128xf32>
    %51 = arith.negf %50 : vector<8x128xf32>
    %52 = math.exp %51 : vector<8x128xf32>
    %cst_21 = arith.constant 1.000000e+00 : f32
    %53 = vector.broadcast %cst_21 : f32 to vector<8x128xf32>
    %54 = arith.addf %53, %52 : vector<8x128xf32>
    %55 = arith.divf %53, %54 : vector<8x128xf32>
    %56 = vector.extract_strided_slice %49 {offsets = [0, 128], sizes = [8, 128], strides = [1, 1]} : vector<8x512xf32> to vector<8x128xf32>
    %57 = arith.negf %56 : vector<8x128xf32>
    %58 = math.exp %57 : vector<8x128xf32>
    %cst_22 = arith.constant 1.000000e+00 : f32
    %59 = vector.broadcast %cst_22 : f32 to vector<8x128xf32>
    %60 = arith.addf %59, %58 : vector<8x128xf32>
    %61 = arith.divf %59, %60 : vector<8x128xf32>
    %62 = vector.extract_strided_slice %49 {offsets = [0, 256], sizes = [8, 128], strides = [1, 1]} : vector<8x512xf32> to vector<8x128xf32>
    %63 = math.tanh %62 : vector<8x128xf32>
    %64 = vector.extract_strided_slice %49 {offsets = [0, 384], sizes = [8, 128], strides = [1, 1]} : vector<8x512xf32> to vector<8x128xf32>
    %65 = arith.negf %64 : vector<8x128xf32>
    %66 = math.exp %65 : vector<8x128xf32>
    %cst_23 = arith.constant 1.000000e+00 : f32
    %67 = vector.broadcast %cst_23 : f32 to vector<8x128xf32>
    %68 = arith.addf %67, %66 : vector<8x128xf32>
    %69 = arith.divf %67, %68 : vector<8x128xf32>
    %70 = arith.mulf %61, %39 : vector<8x128xf32>
    %71 = arith.mulf %55, %63 : vector<8x128xf32>
    %72 = arith.addf %70, %71 : vector<8x128xf32>
    %73 = math.tanh %72 : vector<8x128xf32>
    %74 = arith.mulf %69, %73 : vector<8x128xf32>
    %c2_i32 = arith.constant 2 : i32
    %c8_i32_24 = arith.constant 8 : i32
    %75 = arith.muli %c2_i32, %c8_i32_24 : i32
    %76 = tpu.assume_multiple %75, 8 : i32
    %77 = arith.index_cast %76 : i32 to index
    %c0_25 = arith.constant 0 : index
    %78 = vector.load %arg8[%77, %c0_25] : memref<64x512xf32, #tpu.memory_space<vmem>>, vector<8x512xf32>
    %79 = arith.truncf %74 : vector<8x128xf32> to vector<8x128xbf16>
    %c0_26 = arith.constant 0 : index
    %c0_27 = arith.constant 0 : index
    %80 = vector.load %arg3[%c0_26, %c0_27] : memref<128x512xbf16, #tpu.memory_space<vmem>>, vector<128x512xbf16>
    %cst_28 = arith.constant dense<0.000000e+00> : vector<8x512xf32>
    %81 = tpu.matmul %79, %80, %cst_28 {dimension_numbers = #tpu.dot_dimension_numbers<[1], [0], [0], [1], [0, 0, 1, 1], [], []>} : vector<8x128xbf16>, vector<128x512xbf16>, vector<8x512xf32> -> vector<8x512xf32>
    %82 = arith.addf %78, %81 : vector<8x512xf32>
    %83 = vector.extract_strided_slice %82 {offsets = [0, 0], sizes = [8, 128], strides = [1, 1]} : vector<8x512xf32> to vector<8x128xf32>
    %84 = arith.negf %83 : vector<8x128xf32>
    %85 = math.exp %84 : vector<8x128xf32>
    %cst_29 = arith.constant 1.000000e+00 : f32
    %86 = vector.broadcast %cst_29 : f32 to vector<8x128xf32>
    %87 = arith.addf %86, %85 : vector<8x128xf32>
    %88 = arith.divf %86, %87 : vector<8x128xf32>
    %89 = vector.extract_strided_slice %82 {offsets = [0, 128], sizes = [8, 128], strides = [1, 1]} : vector<8x512xf32> to vector<8x128xf32>
    %90 = arith.negf %89 : vector<8x128xf32>
    %91 = math.exp %90 : vector<8x128xf32>
    %cst_30 = arith.constant 1.000000e+00 : f32
    %92 = vector.broadcast %cst_30 : f32 to vector<8x128xf32>
    %93 = arith.addf %92, %91 : vector<8x128xf32>
    %94 = arith.divf %92, %93 : vector<8x128xf32>
    %95 = vector.extract_strided_slice %82 {offsets = [0, 256], sizes = [8, 128], strides = [1, 1]} : vector<8x512xf32> to vector<8x128xf32>
    %96 = math.tanh %95 : vector<8x128xf32>
    %97 = vector.extract_strided_slice %82 {offsets = [0, 384], sizes = [8, 128], strides = [1, 1]} : vector<8x512xf32> to vector<8x128xf32>
    %98 = arith.negf %97 : vector<8x128xf32>
    %99 = math.exp %98 : vector<8x128xf32>
    %cst_31 = arith.constant 1.000000e+00 : f32
    %100 = vector.broadcast %cst_31 : f32 to vector<8x128xf32>
    %101 = arith.addf %100, %99 : vector<8x128xf32>
    %102 = arith.divf %100, %101 : vector<8x128xf32>
    %103 = arith.mulf %94, %72 : vector<8x128xf32>
    %104 = arith.mulf %88, %96 : vector<8x128xf32>
    %105 = arith.addf %103, %104 : vector<8x128xf32>
    %106 = math.tanh %105 : vector<8x128xf32>
    %107 = arith.mulf %102, %106 : vector<8x128xf32>
    %c3_i32 = arith.constant 3 : i32
    %c8_i32_32 = arith.constant 8 : i32
    %108 = arith.muli %c3_i32, %c8_i32_32 : i32
    %109 = tpu.assume_multiple %108, 8 : i32
    %110 = arith.index_cast %109 : i32 to index
    %c0_33 = arith.constant 0 : index
    %111 = vector.load %arg8[%110, %c0_33] : memref<64x512xf32, #tpu.memory_space<vmem>>, vector<8x512xf32>
    %112 = arith.truncf %107 : vector<8x128xf32> to vector<8x128xbf16>
    %c0_34 = arith.constant 0 : index
    %c0_35 = arith.constant 0 : index
    %113 = vector.load %arg3[%c0_34, %c0_35] : memref<128x512xbf16, #tpu.memory_space<vmem>>, vector<128x512xbf16>
    %cst_36 = arith.constant dense<0.000000e+00> : vector<8x512xf32>
    %114 = tpu.matmul %112, %113, %cst_36 {dimension_numbers = #tpu.dot_dimension_numbers<[1], [0], [0], [1], [0, 0, 1, 1], [], []>} : vector<8x128xbf16>, vector<128x512xbf16>, vector<8x512xf32> -> vector<8x512xf32>
    %115 = arith.addf %111, %114 : vector<8x512xf32>
    %116 = vector.extract_strided_slice %115 {offsets = [0, 0], sizes = [8, 128], strides = [1, 1]} : vector<8x512xf32> to vector<8x128xf32>
    %117 = arith.negf %116 : vector<8x128xf32>
    %118 = math.exp %117 : vector<8x128xf32>
    %cst_37 = arith.constant 1.000000e+00 : f32
    %119 = vector.broadcast %cst_37 : f32 to vector<8x128xf32>
    %120 = arith.addf %119, %118 : vector<8x128xf32>
    %121 = arith.divf %119, %120 : vector<8x128xf32>
    %122 = vector.extract_strided_slice %115 {offsets = [0, 128], sizes = [8, 128], strides = [1, 1]} : vector<8x512xf32> to vector<8x128xf32>
    %123 = arith.negf %122 : vector<8x128xf32>
    %124 = math.exp %123 : vector<8x128xf32>
    %cst_38 = arith.constant 1.000000e+00 : f32
    %125 = vector.broadcast %cst_38 : f32 to vector<8x128xf32>
    %126 = arith.addf %125, %124 : vector<8x128xf32>
    %127 = arith.divf %125, %126 : vector<8x128xf32>
    %128 = vector.extract_strided_slice %115 {offsets = [0, 256], sizes = [8, 128], strides = [1, 1]} : vector<8x512xf32> to vector<8x128xf32>
    %129 = math.tanh %128 : vector<8x128xf32>
    %130 = vector.extract_strided_slice %115 {offsets = [0, 384], sizes = [8, 128], strides = [1, 1]} : vector<8x512xf32> to vector<8x128xf32>
    %131 = arith.negf %130 : vector<8x128xf32>
    %132 = math.exp %131 : vector<8x128xf32>
    %cst_39 = arith.constant 1.000000e+00 : f32
    %133 = vector.broadcast %cst_39 : f32 to vector<8x128xf32>
    %134 = arith.addf %133, %132 : vector<8x128xf32>
    %135 = arith.divf %133, %134 : vector<8x128xf32>
    %136 = arith.mulf %127, %105 : vector<8x128xf32>
    %137 = arith.mulf %121, %129 : vector<8x128xf32>
    %138 = arith.addf %136, %137 : vector<8x128xf32>
    %139 = math.tanh %138 : vector<8x128xf32>
    %140 = arith.mulf %135, %139 : vector<8x128xf32>
    %c4_i32 = arith.constant 4 : i32
    %c8_i32_40 = arith.constant 8 : i32
    %141 = arith.muli %c4_i32, %c8_i32_40 : i32
    %142 = tpu.assume_multiple %141, 8 : i32
    %143 = arith.index_cast %142 : i32 to index
    %c0_41 = arith.constant 0 : index
    %144 = vector.load %arg8[%143, %c0_41] : memref<64x512xf32, #tpu.memory_space<vmem>>, vector<8x512xf32>
    %145 = arith.truncf %140 : vector<8x128xf32> to vector<8x128xbf16>
    %c0_42 = arith.constant 0 : index
    %c0_43 = arith.constant 0 : index
    %146 = vector.load %arg3[%c0_42, %c0_43] : memref<128x512xbf16, #tpu.memory_space<vmem>>, vector<128x512xbf16>
    %cst_44 = arith.constant dense<0.000000e+00> : vector<8x512xf32>
    %147 = tpu.matmul %145, %146, %cst_44 {dimension_numbers = #tpu.dot_dimension_numbers<[1], [0], [0], [1], [0, 0, 1, 1], [], []>} : vector<8x128xbf16>, vector<128x512xbf16>, vector<8x512xf32> -> vector<8x512xf32>
    %148 = arith.addf %144, %147 : vector<8x512xf32>
    %149 = vector.extract_strided_slice %148 {offsets = [0, 0], sizes = [8, 128], strides = [1, 1]} : vector<8x512xf32> to vector<8x128xf32>
    %150 = arith.negf %149 : vector<8x128xf32>
    %151 = math.exp %150 : vector<8x128xf32>
    %cst_45 = arith.constant 1.000000e+00 : f32
    %152 = vector.broadcast %cst_45 : f32 to vector<8x128xf32>
    %153 = arith.addf %152, %151 : vector<8x128xf32>
    %154 = arith.divf %152, %153 : vector<8x128xf32>
    %155 = vector.extract_strided_slice %148 {offsets = [0, 128], sizes = [8, 128], strides = [1, 1]} : vector<8x512xf32> to vector<8x128xf32>
    %156 = arith.negf %155 : vector<8x128xf32>
    %157 = math.exp %156 : vector<8x128xf32>
    %cst_46 = arith.constant 1.000000e+00 : f32
    %158 = vector.broadcast %cst_46 : f32 to vector<8x128xf32>
    %159 = arith.addf %158, %157 : vector<8x128xf32>
    %160 = arith.divf %158, %159 : vector<8x128xf32>
    %161 = vector.extract_strided_slice %148 {offsets = [0, 256], sizes = [8, 128], strides = [1, 1]} : vector<8x512xf32> to vector<8x128xf32>
    %162 = math.tanh %161 : vector<8x128xf32>
    %163 = vector.extract_strided_slice %148 {offsets = [0, 384], sizes = [8, 128], strides = [1, 1]} : vector<8x512xf32> to vector<8x128xf32>
    %164 = arith.negf %163 : vector<8x128xf32>
    %165 = math.exp %164 : vector<8x128xf32>
    %cst_47 = arith.constant 1.000000e+00 : f32
    %166 = vector.broadcast %cst_47 : f32 to vector<8x128xf32>
    %167 = arith.addf %166, %165 : vector<8x128xf32>
    %168 = arith.divf %166, %167 : vector<8x128xf32>
    %169 = arith.mulf %160, %138 : vector<8x128xf32>
    %170 = arith.mulf %154, %162 : vector<8x128xf32>
    %171 = arith.addf %169, %170 : vector<8x128xf32>
    %172 = math.tanh %171 : vector<8x128xf32>
    %173 = arith.mulf %168, %172 : vector<8x128xf32>
    %c5_i32 = arith.constant 5 : i32
    %c8_i32_48 = arith.constant 8 : i32
    %174 = arith.muli %c5_i32, %c8_i32_48 : i32
    %175 = tpu.assume_multiple %174, 8 : i32
    %176 = arith.index_cast %175 : i32 to index
    %c0_49 = arith.constant 0 : index
    %177 = vector.load %arg8[%176, %c0_49] : memref<64x512xf32, #tpu.memory_space<vmem>>, vector<8x512xf32>
    %178 = arith.truncf %173 : vector<8x128xf32> to vector<8x128xbf16>
    %c0_50 = arith.constant 0 : index
    %c0_51 = arith.constant 0 : index
    %179 = vector.load %arg3[%c0_50, %c0_51] : memref<128x512xbf16, #tpu.memory_space<vmem>>, vector<128x512xbf16>
    %cst_52 = arith.constant dense<0.000000e+00> : vector<8x512xf32>
    %180 = tpu.matmul %178, %179, %cst_52 {dimension_numbers = #tpu.dot_dimension_numbers<[1], [0], [0], [1], [0, 0, 1, 1], [], []>} : vector<8x128xbf16>, vector<128x512xbf16>, vector<8x512xf32> -> vector<8x512xf32>
    %181 = arith.addf %177, %180 : vector<8x512xf32>
    %182 = vector.extract_strided_slice %181 {offsets = [0, 0], sizes = [8, 128], strides = [1, 1]} : vector<8x512xf32> to vector<8x128xf32>
    %183 = arith.negf %182 : vector<8x128xf32>
    %184 = math.exp %183 : vector<8x128xf32>
    %cst_53 = arith.constant 1.000000e+00 : f32
    %185 = vector.broadcast %cst_53 : f32 to vector<8x128xf32>
    %186 = arith.addf %185, %184 : vector<8x128xf32>
    %187 = arith.divf %185, %186 : vector<8x128xf32>
    %188 = vector.extract_strided_slice %181 {offsets = [0, 128], sizes = [8, 128], strides = [1, 1]} : vector<8x512xf32> to vector<8x128xf32>
    %189 = arith.negf %188 : vector<8x128xf32>
    %190 = math.exp %189 : vector<8x128xf32>
    %cst_54 = arith.constant 1.000000e+00 : f32
    %191 = vector.broadcast %cst_54 : f32 to vector<8x128xf32>
    %192 = arith.addf %191, %190 : vector<8x128xf32>
    %193 = arith.divf %191, %192 : vector<8x128xf32>
    %194 = vector.extract_strided_slice %181 {offsets = [0, 256], sizes = [8, 128], strides = [1, 1]} : vector<8x512xf32> to vector<8x128xf32>
    %195 = math.tanh %194 : vector<8x128xf32>
    %196 = vector.extract_strided_slice %181 {offsets = [0, 384], sizes = [8, 128], strides = [1, 1]} : vector<8x512xf32> to vector<8x128xf32>
    %197 = arith.negf %196 : vector<8x128xf32>
    %198 = math.exp %197 : vector<8x128xf32>
    %cst_55 = arith.constant 1.000000e+00 : f32
    %199 = vector.broadcast %cst_55 : f32 to vector<8x128xf32>
    %200 = arith.addf %199, %198 : vector<8x128xf32>
    %201 = arith.divf %199, %200 : vector<8x128xf32>
    %202 = arith.mulf %193, %171 : vector<8x128xf32>
    %203 = arith.mulf %187, %195 : vector<8x128xf32>
    %204 = arith.addf %202, %203 : vector<8x128xf32>
    %205 = math.tanh %204 : vector<8x128xf32>
    %206 = arith.mulf %201, %205 : vector<8x128xf32>
    %c6_i32 = arith.constant 6 : i32
    %c8_i32_56 = arith.constant 8 : i32
    %207 = arith.muli %c6_i32, %c8_i32_56 : i32
    %208 = tpu.assume_multiple %207, 8 : i32
    %209 = arith.index_cast %208 : i32 to index
    %c0_57 = arith.constant 0 : index
    %210 = vector.load %arg8[%209, %c0_57] : memref<64x512xf32, #tpu.memory_space<vmem>>, vector<8x512xf32>
    %211 = arith.truncf %206 : vector<8x128xf32> to vector<8x128xbf16>
    %c0_58 = arith.constant 0 : index
    %c0_59 = arith.constant 0 : index
    %212 = vector.load %arg3[%c0_58, %c0_59] : memref<128x512xbf16, #tpu.memory_space<vmem>>, vector<128x512xbf16>
    %cst_60 = arith.constant dense<0.000000e+00> : vector<8x512xf32>
    %213 = tpu.matmul %211, %212, %cst_60 {dimension_numbers = #tpu.dot_dimension_numbers<[1], [0], [0], [1], [0, 0, 1, 1], [], []>} : vector<8x128xbf16>, vector<128x512xbf16>, vector<8x512xf32> -> vector<8x512xf32>
    %214 = arith.addf %210, %213 : vector<8x512xf32>
    %215 = vector.extract_strided_slice %214 {offsets = [0, 0], sizes = [8, 128], strides = [1, 1]} : vector<8x512xf32> to vector<8x128xf32>
    %216 = arith.negf %215 : vector<8x128xf32>
    %217 = math.exp %216 : vector<8x128xf32>
    %cst_61 = arith.constant 1.000000e+00 : f32
    %218 = vector.broadcast %cst_61 : f32 to vector<8x128xf32>
    %219 = arith.addf %218, %217 : vector<8x128xf32>
    %220 = arith.divf %218, %219 : vector<8x128xf32>
    %221 = vector.extract_strided_slice %214 {offsets = [0, 128], sizes = [8, 128], strides = [1, 1]} : vector<8x512xf32> to vector<8x128xf32>
    %222 = arith.negf %221 : vector<8x128xf32>
    %223 = math.exp %222 : vector<8x128xf32>
    %cst_62 = arith.constant 1.000000e+00 : f32
    %224 = vector.broadcast %cst_62 : f32 to vector<8x128xf32>
    %225 = arith.addf %224, %223 : vector<8x128xf32>
    %226 = arith.divf %224, %225 : vector<8x128xf32>
    %227 = vector.extract_strided_slice %214 {offsets = [0, 256], sizes = [8, 128], strides = [1, 1]} : vector<8x512xf32> to vector<8x128xf32>
    %228 = math.tanh %227 : vector<8x128xf32>
    %229 = vector.extract_strided_slice %214 {offsets = [0, 384], sizes = [8, 128], strides = [1, 1]} : vector<8x512xf32> to vector<8x128xf32>
    %230 = arith.negf %229 : vector<8x128xf32>
    %231 = math.exp %230 : vector<8x128xf32>
    %cst_63 = arith.constant 1.000000e+00 : f32
    %232 = vector.broadcast %cst_63 : f32 to vector<8x128xf32>
    %233 = arith.addf %232, %231 : vector<8x128xf32>
    %234 = arith.divf %232, %233 : vector<8x128xf32>
    %235 = arith.mulf %226, %204 : vector<8x128xf32>
    %236 = arith.mulf %220, %228 : vector<8x128xf32>
    %237 = arith.addf %235, %236 : vector<8x128xf32>
    %238 = math.tanh %237 : vector<8x128xf32>
    %239 = arith.mulf %234, %238 : vector<8x128xf32>
    %c7_i32 = arith.constant 7 : i32
    %c8_i32_64 = arith.constant 8 : i32
    %240 = arith.muli %c7_i32, %c8_i32_64 : i32
    %241 = tpu.assume_multiple %240, 8 : i32
    %242 = arith.index_cast %241 : i32 to index
    %c0_65 = arith.constant 0 : index
    %243 = vector.load %arg8[%242, %c0_65] : memref<64x512xf32, #tpu.memory_space<vmem>>, vector<8x512xf32>
    %244 = arith.truncf %239 : vector<8x128xf32> to vector<8x128xbf16>
    %c0_66 = arith.constant 0 : index
    %c0_67 = arith.constant 0 : index
    %245 = vector.load %arg3[%c0_66, %c0_67] : memref<128x512xbf16, #tpu.memory_space<vmem>>, vector<128x512xbf16>
    %cst_68 = arith.constant dense<0.000000e+00> : vector<8x512xf32>
    %246 = tpu.matmul %244, %245, %cst_68 {dimension_numbers = #tpu.dot_dimension_numbers<[1], [0], [0], [1], [0, 0, 1, 1], [], []>} : vector<8x128xbf16>, vector<128x512xbf16>, vector<8x512xf32> -> vector<8x512xf32>
    %247 = arith.addf %243, %246 : vector<8x512xf32>
    %248 = vector.extract_strided_slice %247 {offsets = [0, 0], sizes = [8, 128], strides = [1, 1]} : vector<8x512xf32> to vector<8x128xf32>
    %249 = arith.negf %248 : vector<8x128xf32>
    %250 = math.exp %249 : vector<8x128xf32>
    %cst_69 = arith.constant 1.000000e+00 : f32
    %251 = vector.broadcast %cst_69 : f32 to vector<8x128xf32>
    %252 = arith.addf %251, %250 : vector<8x128xf32>
    %253 = arith.divf %251, %252 : vector<8x128xf32>
    %254 = vector.extract_strided_slice %247 {offsets = [0, 128], sizes = [8, 128], strides = [1, 1]} : vector<8x512xf32> to vector<8x128xf32>
    %255 = arith.negf %254 : vector<8x128xf32>
    %256 = math.exp %255 : vector<8x128xf32>
    %cst_70 = arith.constant 1.000000e+00 : f32
    %257 = vector.broadcast %cst_70 : f32 to vector<8x128xf32>
    %258 = arith.addf %257, %256 : vector<8x128xf32>
    %259 = arith.divf %257, %258 : vector<8x128xf32>
    %260 = vector.extract_strided_slice %247 {offsets = [0, 256], sizes = [8, 128], strides = [1, 1]} : vector<8x512xf32> to vector<8x128xf32>
    %261 = math.tanh %260 : vector<8x128xf32>
    %262 = vector.extract_strided_slice %247 {offsets = [0, 384], sizes = [8, 128], strides = [1, 1]} : vector<8x512xf32> to vector<8x128xf32>
    %263 = arith.negf %262 : vector<8x128xf32>
    %264 = math.exp %263 : vector<8x128xf32>
    %cst_71 = arith.constant 1.000000e+00 : f32
    %265 = vector.broadcast %cst_71 : f32 to vector<8x128xf32>
    %266 = arith.addf %265, %264 : vector<8x128xf32>
    %267 = arith.divf %265, %266 : vector<8x128xf32>
    %268 = arith.mulf %259, %237 : vector<8x128xf32>
    %269 = arith.mulf %253, %261 : vector<8x128xf32>
    %270 = arith.addf %268, %269 : vector<8x128xf32>
    %271 = math.tanh %270 : vector<8x128xf32>
    %272 = arith.mulf %267, %271 : vector<8x128xf32>
    %c8_i32_72 = arith.constant 8 : i32
    %c0_73 = arith.constant 0 : index
    %c0_74 = arith.constant 0 : index
    %273 = vector.load %arg6[%c0_73, %c0_74] : memref<1x128xf32, #tpu.memory_space<vmem>>, vector<1x128xf32>
    %274 = vector.extract_strided_slice %270 {offsets = [0, 0], sizes = [1, 128], strides = [1, 1]} : vector<8x128xf32> to vector<1x128xf32>
    %c0_75 = arith.constant 0 : index
    %c0_76 = arith.constant 0 : index
    %c0_77 = arith.constant 0 : index
    %275 = vector.load %arg5[%c0_75, %c0_76, %c0_77] : memref<8x128x128xf32, #tpu.memory_space<vmem>>, vector<1x128x128xf32>
    %276 = vector.shape_cast %275 : vector<1x128x128xf32> to vector<128x128xf32>
    %cst_78 = arith.constant dense<0.000000e+00> : vector<1x128xf32>
    %277 = tpu.matmul %274, %276, %cst_78 {dimension_numbers = #tpu.dot_dimension_numbers<[1], [0], [0], [1], [0, 0, 1, 1], [], []>} : vector<1x128xf32>, vector<128x128xf32>, vector<1x128xf32> -> vector<1x128xf32>
    %278 = arith.addf %273, %277 : vector<1x128xf32>
    %279 = vector.extract_strided_slice %270 {offsets = [1, 0], sizes = [1, 128], strides = [1, 1]} : vector<8x128xf32> to vector<1x128xf32>
    %c1 = arith.constant 1 : index
    %c0_79 = arith.constant 0 : index
    %c0_80 = arith.constant 0 : index
    %280 = vector.load %arg5[%c1, %c0_79, %c0_80] : memref<8x128x128xf32, #tpu.memory_space<vmem>>, vector<1x128x128xf32>
    %281 = vector.shape_cast %280 : vector<1x128x128xf32> to vector<128x128xf32>
    %cst_81 = arith.constant dense<0.000000e+00> : vector<1x128xf32>
    %282 = tpu.matmul %279, %281, %cst_81 {dimension_numbers = #tpu.dot_dimension_numbers<[1], [0], [0], [1], [0, 0, 1, 1], [], []>} : vector<1x128xf32>, vector<128x128xf32>, vector<1x128xf32> -> vector<1x128xf32>
    %283 = arith.addf %278, %282 : vector<1x128xf32>
    %284 = vector.extract_strided_slice %270 {offsets = [2, 0], sizes = [1, 128], strides = [1, 1]} : vector<8x128xf32> to vector<1x128xf32>
    %c2 = arith.constant 2 : index
    %c0_82 = arith.constant 0 : index
    %c0_83 = arith.constant 0 : index
    %285 = vector.load %arg5[%c2, %c0_82, %c0_83] : memref<8x128x128xf32, #tpu.memory_space<vmem>>, vector<1x128x128xf32>
    %286 = vector.shape_cast %285 : vector<1x128x128xf32> to vector<128x128xf32>
    %cst_84 = arith.constant dense<0.000000e+00> : vector<1x128xf32>
    %287 = tpu.matmul %284, %286, %cst_84 {dimension_numbers = #tpu.dot_dimension_numbers<[1], [0], [0], [1], [0, 0, 1, 1], [], []>} : vector<1x128xf32>, vector<128x128xf32>, vector<1x128xf32> -> vector<1x128xf32>
    %288 = arith.addf %283, %287 : vector<1x128xf32>
    %289 = vector.extract_strided_slice %270 {offsets = [3, 0], sizes = [1, 128], strides = [1, 1]} : vector<8x128xf32> to vector<1x128xf32>
    %c3 = arith.constant 3 : index
    %c0_85 = arith.constant 0 : index
    %c0_86 = arith.constant 0 : index
    %290 = vector.load %arg5[%c3, %c0_85, %c0_86] : memref<8x128x128xf32, #tpu.memory_space<vmem>>, vector<1x128x128xf32>
    %291 = vector.shape_cast %290 : vector<1x128x128xf32> to vector<128x128xf32>
    %cst_87 = arith.constant dense<0.000000e+00> : vector<1x128xf32>
    %292 = tpu.matmul %289, %291, %cst_87 {dimension_numbers = #tpu.dot_dimension_numbers<[1], [0], [0], [1], [0, 0, 1, 1], [], []>} : vector<1x128xf32>, vector<128x128xf32>, vector<1x128xf32> -> vector<1x128xf32>
    %293 = arith.addf %288, %292 : vector<1x128xf32>
    %294 = vector.extract_strided_slice %270 {offsets = [4, 0], sizes = [1, 128], strides = [1, 1]} : vector<8x128xf32> to vector<1x128xf32>
    %c4 = arith.constant 4 : index
    %c0_88 = arith.constant 0 : index
    %c0_89 = arith.constant 0 : index
    %295 = vector.load %arg5[%c4, %c0_88, %c0_89] : memref<8x128x128xf32, #tpu.memory_space<vmem>>, vector<1x128x128xf32>
    %296 = vector.shape_cast %295 : vector<1x128x128xf32> to vector<128x128xf32>
    %cst_90 = arith.constant dense<0.000000e+00> : vector<1x128xf32>
    %297 = tpu.matmul %294, %296, %cst_90 {dimension_numbers = #tpu.dot_dimension_numbers<[1], [0], [0], [1], [0, 0, 1, 1], [], []>} : vector<1x128xf32>, vector<128x128xf32>, vector<1x128xf32> -> vector<1x128xf32>
    %298 = arith.addf %293, %297 : vector<1x128xf32>
    %299 = vector.extract_strided_slice %270 {offsets = [5, 0], sizes = [1, 128], strides = [1, 1]} : vector<8x128xf32> to vector<1x128xf32>
    %c5 = arith.constant 5 : index
    %c0_91 = arith.constant 0 : index
    %c0_92 = arith.constant 0 : index
    %300 = vector.load %arg5[%c5, %c0_91, %c0_92] : memref<8x128x128xf32, #tpu.memory_space<vmem>>, vector<1x128x128xf32>
    %301 = vector.shape_cast %300 : vector<1x128x128xf32> to vector<128x128xf32>
    %cst_93 = arith.constant dense<0.000000e+00> : vector<1x128xf32>
    %302 = tpu.matmul %299, %301, %cst_93 {dimension_numbers = #tpu.dot_dimension_numbers<[1], [0], [0], [1], [0, 0, 1, 1], [], []>} : vector<1x128xf32>, vector<128x128xf32>, vector<1x128xf32> -> vector<1x128xf32>
    %303 = arith.addf %298, %302 : vector<1x128xf32>
    %304 = vector.extract_strided_slice %270 {offsets = [6, 0], sizes = [1, 128], strides = [1, 1]} : vector<8x128xf32> to vector<1x128xf32>
    %c6 = arith.constant 6 : index
    %c0_94 = arith.constant 0 : index
    %c0_95 = arith.constant 0 : index
    %305 = vector.load %arg5[%c6, %c0_94, %c0_95] : memref<8x128x128xf32, #tpu.memory_space<vmem>>, vector<1x128x128xf32>
    %306 = vector.shape_cast %305 : vector<1x128x128xf32> to vector<128x128xf32>
    %cst_96 = arith.constant dense<0.000000e+00> : vector<1x128xf32>
    %307 = tpu.matmul %304, %306, %cst_96 {dimension_numbers = #tpu.dot_dimension_numbers<[1], [0], [0], [1], [0, 0, 1, 1], [], []>} : vector<1x128xf32>, vector<128x128xf32>, vector<1x128xf32> -> vector<1x128xf32>
    %308 = arith.addf %303, %307 : vector<1x128xf32>
    %c0_97 = arith.constant 0 : index
    %c0_98 = arith.constant 0 : index
    %309 = vector.load %arg7[%c0_97, %c0_98] : memref<1x128xf32, #tpu.memory_space<vmem>>, vector<1x128xf32>
    tpu.vector_store %arg7[%c0_97, %c0_98], %308 {strides = array<i32>} : memref<1x128xf32, #tpu.memory_space<vmem>>, vector<1x128xf32>,
    return
  }
  func.func @transform_0(%arg0: i32) -> (i32, i32) {
    %c0_i32 = arith.constant 0 : i32
    %c0_i32_0 = arith.constant 0 : i32
    %c0_i32_1 = arith.constant 0 : i32
    return %c0_i32, %c0_i32_0 : i32, i32
  }
  func.func @transform_1(%arg0: i32) -> (i32, i32) {
    %c0_i32 = arith.constant 0 : i32
    %c0_i32_0 = arith.constant 0 : i32
    %c0_i32_1 = arith.constant 0 : i32
    return %c0_i32, %c0_i32_0 : i32, i32
  }
  func.func @transform_2(%arg0: i32) -> (i32, i32) {
    %c0_i32 = arith.constant 0 : i32
    %c0_i32_0 = arith.constant 0 : i32
    %c0_i32_1 = arith.constant 0 : i32
    return %c0_i32, %c0_i32_0 : i32, i32
  }
  func.func @transform_3(%arg0: i32) -> (i32, i32) {
    %c0_i32 = arith.constant 0 : i32
    %c0_i32_0 = arith.constant 0 : i32
    %c0_i32_1 = arith.constant 0 : i32
    return %c0_i32, %c0_i32_0 : i32, i32
  }
  func.func @transform_4(%arg0: i32) -> (i32, i32, i32) {
    %c0_i32 = arith.constant 0 : i32
    %c0_i32_0 = arith.constant 0 : i32
    %c0_i32_1 = arith.constant 0 : i32
    %c0_i32_2 = arith.constant 0 : i32
    return %c0_i32, %c0_i32_0, %c0_i32_1 : i32, i32, i32
  }
  func.func @transform_5(%arg0: i32) -> (i32, i32) {
    %c0_i32 = arith.constant 0 : i32
    %c0_i32_0 = arith.constant 0 : i32
    %c0_i32_1 = arith.constant 0 : i32
    return %c0_i32, %c0_i32_0 : i32, i32
  }
  func.func @transform_6(%arg0: i32) -> (i32, i32) {
    %c0_i32 = arith.constant 0 : i32
    %c0_i32_0 = arith.constant 0 : i32
    %c0_i32_1 = arith.constant 0 : i32
    return %c0_i32, %c0_i32_0 : i32, i32
  }
}

</mosaic_0001>

<bundles_post_ra>
// kernel: a_call__.1
= control target key start
LH: loop header
LB: loop body
LE: loop exit
PB: predicated region body
PF: predicated region fallthrough
CT: control target
= control target key end

     0   :  { %v4895_v20 = vmov 0   ;;  %vm3504_vm0 = vmmov 0   ;;  %s4888_s1 = inlined_call_operand.vmem [shape: bf16[256,512], index: 1, kind: input, shape index: {}]   ;;  %s4889_s0 = inlined_call_operand.vmem [shape: bf16[64,256], index: 0, kind: input, shape index: {}]   ;;  %s4890_s2 = inlined_call_operand.vmem [shape: bf16[128,512], index: 2, kind: input, shape index: {}]   ;;  %s4891_s3 = inlined_call_operand.vmem [shape: f32[1,512], index: 3, kind: input, shape index: {}]   ;;  %s4892_s4 = inlined_call_operand.vmem [shape: f32[8,128,128], index: 4, kind: input, shape index: {}]   ;;  %s4893_s5 = inlined_call_operand.vmem [shape: f32[1,128], index: 5, kind: input, shape index: {}]   ;;  %s4894_s6 = inlined_call_operand.vmem [shape: f32[1,128], index: 6, kind: output, shape index: {}]  }
   0x1   :  { %v3193_v0 = vld [vmem:[%s4888_s1 + $0x4] ss:$16 sps:$4 sm:$0xff]   ;;  %v3195_v1 = vld [vmem:[%s4888_s1] ss:$16 sps:$4 sm:$0xff]   ;;  %1005 = vmatprep.mubr.bf16.mxu0 %v4895_v20  ;;  %v3246_v41 = vld [vmem:[%s4888_s1 + $0xc] ss:$16 sps:$4 sm:$0xff]  }
   0x2   :  { %478 = vmatprep.subr.bf16.mxu1 %v3193_v0  ;;  %v3196_v2 = vld [vmem:[%s4888_s1 + $0x24] ss:$16 sps:$4 sm:$0xff]   ;;  %v3198_v3 = vld [vmem:[%s4888_s1 + $0x20] ss:$16 sps:$4 sm:$0xff]   ;;  %v3244_v45 = vld [vmem:[%s4888_s1 + $0x8] ss:$16 sps:$4 sm:$0xff]  }
   0x3   :  { %479 = vmatpush1.bf16.msra.mxu1 %v3195_v1  ;;  %v3199_v4 = vld [vmem:[%s4888_s1 + $0x44] ss:$16 sps:$4 sm:$0xff]   ;;  %v3201_v5 = vld [vmem:[%s4888_s1 + $0x40] ss:$16 sps:$4 sm:$0xff]   ;;  %v3249_v47 = vld [vmem:[%s4888_s1 + $0x2c] ss:$16 sps:$4 sm:$0xff]  }
   0x4   :  { %480 = vmatprep.subr.bf16.mxu1 %v3196_v2  ;;  %v3202_v6 = vld [vmem:[%s4888_s1 + $0x64] ss:$16 sps:$4 sm:$0xff]   ;;  %v3204_v7 = vld [vmem:[%s4888_s1 + $0x60] ss:$16 sps:$4 sm:$0xff]   ;;  %v3247_v49 = vld [vmem:[%s4888_s1 + $0x28] ss:$16 sps:$4 sm:$0xff]  }
   0x5   :  { %v3205_v8 = vld [vmem:[%s4888_s1 + $0x84] ss:$16 sps:$4 sm:$0xff]   ;;  %v3207_v9 = vld [vmem:[%s4888_s1 + $0x80] ss:$16 sps:$4 sm:$0xff]   ;;  %v3252_v51 = vld [vmem:[%s4888_s1 + $0x4c] ss:$16 sps:$4 sm:$0xff]  }
   0x6   :  { %v3208_v10 = vld [vmem:[%s4888_s1 + $0xa4] ss:$16 sps:$4 sm:$0xff]   ;;  %v3210_v11 = vld [vmem:[%s4888_s1 + $0xa0] ss:$16 sps:$4 sm:$0xff]   ;;  %v3250_v54 = vld [vmem:[%s4888_s1 + $0x48] ss:$16 sps:$4 sm:$0xff]  }
   0x7   :  { %481 = vmatpush1.bf16.msra.mxu1 %v3198_v3  ;;  %v3211_v12 = vld [vmem:[%s4888_s1 + $0xc4] ss:$16 sps:$4 sm:$0xff]   ;;  %v3213_v14 = vld [vmem:[%s4888_s1 + $0xc0] ss:$16 sps:$4 sm:$0xff]   ;;  %v3255_v57 = vld [vmem:[%s4888_s1 + $0x6c] ss:$16 sps:$4 sm:$0xff]  }
   0x8   :  { %482 = vmatprep.subr.bf16.mxu1 %v3199_v4  ;;  %v3583_v13 = vld [vmem:[%s4889_s0 + $0x4] ss:$8 sps:$4 sm:$0xff]   ;;  %v3216_v16 = vld [vmem:[%s4888_s1 + $0xe0] ss:$16 sps:$4 sm:$0xff]   ;;  %v3710_v46 = vld [vmem:[%s4889_s0 + $0x14] ss:$8 sps:$4 sm:$0xff]  }
   0x9   :  { %v3214_v15 = vld [vmem:[%s4888_s1 + $0xe4] ss:$16 sps:$4 sm:$0xff]   ;;  %510 = vmatprep.mubr.bf16.mxu1 %v3583_v13  ;;  %v3219_v18 = vld [vmem:[%s4888_s1 + $0x100] ss:$16 sps:$4 sm:$0xff]   ;;  %v3253_v59 = vld [vmem:[%s4888_s1 + $0x68] ss:$16 sps:$4 sm:$0xff]  }
   0xa   :  { %v3217_v17 = vld [vmem:[%s4888_s1 + $0x104] ss:$16 sps:$4 sm:$0xff]   ;;  %v3222_v21 = vld [vmem:[%s4888_s1 + $0x120] ss:$16 sps:$4 sm:$0xff]   ;;  %v3258_v61 = vld [vmem:[%s4888_s1 + $0x8c] ss:$16 sps:$4 sm:$0xff]  }
   0xb   :  { %483 = vmatpush1.bf16.msra.mxu1 %v3201_v5  ;;  %v3220_v19 = vld [vmem:[%s4888_s1 + $0x124] ss:$16 sps:$4 sm:$0xff]   ;;  %v3225_v23 = vld [vmem:[%s4888_s1 + $0x140] ss:$16 sps:$4 sm:$0xff]   ;;  %v3256_v0 = vld [vmem:[%s4888_s1 + $0x88] ss:$16 sps:$4 sm:$0xff]  }
   0xc   :  { %484 = vmatprep.subr.bf16.mxu1 %v3202_v6  ;;  %v3223_v22 = vld [vmem:[%s4888_s1 + $0x144] ss:$16 sps:$4 sm:$0xff]   ;;  %v3228_v25 = vld [vmem:[%s4888_s1 + $0x160] ss:$16 sps:$4 sm:$0xff]   ;;  %v3261_v2 = vld [vmem:[%s4888_s1 + $0xac] ss:$16 sps:$4 sm:$0xff]  }
   0xd   :  { %v3226_v24 = vld [vmem:[%s4888_s1 + $0x164] ss:$16 sps:$4 sm:$0xff]   ;;  %v3231_v27 = vld [vmem:[%s4888_s1 + $0x180] ss:$16 sps:$4 sm:$0xff]   ;;  %v3259_v3 = vld [vmem:[%s4888_s1 + $0xa8] ss:$16 sps:$4 sm:$0xff]  }
   0xe   :  { %v3229_v26 = vld [vmem:[%s4888_s1 + $0x184] ss:$16 sps:$4 sm:$0xff]   ;;  %v3637_v30 = vld [vmem:[%s4890_s2] ss:$16 sps:$4 sm:$0xff]   ;;  %v3264_v4 = vld [vmem:[%s4888_s1 + $0xcc] ss:$16 sps:$4 sm:$0xff]  }
   0xf   :  { %485 = vmatpush1.bf16.msra.mxu1 %v3204_v7  ;;  %v3232_v28 = vld [vmem:[%s4888_s1 + $0x1a4] ss:$16 sps:$4 sm:$0xff]   ;;  %v3234_v32 = vld [vmem:[%s4888_s1 + $0x1a0] ss:$16 sps:$4 sm:$0xff]   ;;  %v3262_v6 = vld [vmem:[%s4888_s1 + $0xc8] ss:$16 sps:$4 sm:$0xff]  }
  0x10   :  { %486 = vmatprep.subr.bf16.mxu1 %v3205_v8  ;;  %v3632_v29 = vld [vmem:[%s4890_s2 + $0x4] ss:$16 sps:$4 sm:$0xff]   ;;  %v3656_v34 = vld [vmem:[%s4890_s2 + $0x20] ss:$16 sps:$4 sm:$0xff]   ;;  %v3267_v7 = vld [vmem:[%s4888_s1 + $0xec] ss:$16 sps:$4 sm:$0xff]  }
  0x11   :  { %v3642_v31 = vld [vmem:[%s4890_s2 + $0x24] ss:$16 sps:$4 sm:$0xff]   ;;  %973 = vmatprep.subr.bf16.mxu0 %v3632_v29  ;;  %v3237_v36 = vld [vmem:[%s4888_s1 + $0x1c0] ss:$16 sps:$4 sm:$0xff]   ;;  %v3265_v8 = vld [vmem:[%s4888_s1 + $0xe8] ss:$16 sps:$4 sm:$0xff]  }
  0x12   :  { %974 = vmatpush1.bf16.msra.mxu0 %v3637_v30  ;;  %v3235_v33 = vld [vmem:[%s4888_s1 + $0x1c4] ss:$16 sps:$4 sm:$0xff]   ;;  %v3674_v38 = vld [vmem:[%s4890_s2 + $0x40] ss:$16 sps:$4 sm:$0xff]  }
  0x13   :  { %487 = vmatpush1.bf16.msra.mxu1 %v3207_v9  ;;  %975 = vmatprep.subr.bf16.mxu0 %v3642_v31  ;;  %v3661_v35 = vld [vmem:[%s4890_s2 + $0x44] ss:$16 sps:$4 sm:$0xff]   ;;  %v3240_v40 = vld [vmem:[%s4888_s1 + $0x1e0] ss:$16 sps:$4 sm:$0xff]   ;;  %v3270_v9 = vld [vmem:[%s4888_s1 + $0x10c] ss:$16 sps:$4 sm:$0xff]  }
  0x14   :  { %488 = vmatprep.subr.bf16.mxu1 %v3208_v10  ;;  %v3238_v37 = vld [vmem:[%s4888_s1 + $0x1e4] ss:$16 sps:$4 sm:$0xff]   ;;  %v3692_v42 = vld [vmem:[%s4890_s2 + $0x60] ss:$16 sps:$4 sm:$0xff]   ;;  %v3268_v10 = vld [vmem:[%s4888_s1 + $0x108] ss:$16 sps:$4 sm:$0xff]  }
  0x15   :  { %v3679_v39 = vld [vmem:[%s4890_s2 + $0x64] ss:$16 sps:$4 sm:$0xff]   ;;  %v3697_v43 = vld [vmem:[%s4889_s0] ss:$8 sps:$4 sm:$0xff]   ;;  %v3740_v52 = vld [vmem:[%s4889_s0 + $0x10] ss:$8 sps:$4 sm:$0xff]  }
  0x16   :  { %976 = vmatpush1.bf16.msra.mxu0 %v3656_v34  ;;  %v3702_v44 = vld [vmem:[%s4890_s2 + $0x84] ss:$16 sps:$4 sm:$0xff]   ;;  %v3721_v48 = vld [vmem:[%s4890_s2 + $0x80] ss:$16 sps:$4 sm:$0xff]  }
  0x17   :  { %489 = vmatpush1.bf16.msra.mxu1 %v3210_v11  ;;  %977 = vmatprep.subr.bf16.mxu0 %v3661_v35  ;;  %v3730_v50 = vld [vmem:[%s4890_s2 + $0xa4] ss:$16 sps:$4 sm:$0xff]   ;;  %v3745_v53 = vld [vmem:[%s4890_s2 + $0xa0] ss:$16 sps:$4 sm:$0xff]   ;;  %v3273_v11 = vld [vmem:[%s4888_s1 + $0x12c] ss:$16 sps:$4 sm:$0xff]  }
  0x18   :  { %490 = vmatprep.subr.bf16.mxu1 %v3211_v12  ;;  %v3753_v55 = vld [vmem:[%s4889_s0 + $0x24] ss:$8 sps:$4 sm:$0xff]   ;;  %v3769_v58 = vld [vmem:[%s4890_s2 + $0xc0] ss:$16 sps:$4 sm:$0xff]   ;;  %v3801_v1 = vld [vmem:[%s4889_s0 + $0x34] ss:$8 sps:$4 sm:$0xff]  }
  0x19   :  { %v3758_v56 = vld [vmem:[%s4890_s2 + $0xc4] ss:$16 sps:$4 sm:$0xff]   ;;  %v3788_v62 = vld [vmem:[%s4889_s0 + $0x20] ss:$8 sps:$4 sm:$0xff]   ;;  %v3294_v5 = vld [vmem:[%s4889_s0 + $0x30] ss:$8 sps:$4 sm:$0xff]  }
  0x1a   :  { %978 = vmatpush1.bf16.msra.mxu0 %v3674_v38  ;;  %v3778_v60 = vld [vmem:[%s4890_s2 + $0xe4] ss:$16 sps:$4 sm:$0xff]   ;;  %v3793_v63 = vld [vmem:[%s4890_s2 + $0xe0] ss:$16 sps:$4 sm:$0xff]   ;;  %v3271_v12 = vld [vmem:[%s4888_s1 + $0x128] ss:$16 sps:$4 sm:$0xff]  }
  0x1b   :  { %491 = vmatpush1.bf16.msra.mxu1 %v3213_v14  ;;  %979 = vmatprep.subr.bf16.mxu0 %v3679_v39  ;;  %v3277_v14 = vld [vmem:[%s4888_s1 + $0x148] ss:$16 sps:$4 sm:$0xff]  }
  0x1c   :  { %492 = vmatprep.subr.bf16.mxu1 %v3214_v15  ;;  %v3282_v15 = vld [vmem:[%s4888_s1 + $0x16c] ss:$16 sps:$4 sm:$0xff]  }
  0x1e   :  { %980 = vmatpush1.bf16.msra.mxu0 %v3692_v42 }
  0x1f   :  { %493 = vmatpush1.bf16.msra.mxu1 %v3216_v16  ;;  %981 = vmatprep.subr.bf16.mxu0 %v3702_v44  ;;  %v3280_v16 = vld [vmem:[%s4888_s1 + $0x168] ss:$16 sps:$4 sm:$0xff]  }
  0x20   :  { %494 = vmatprep.subr.bf16.mxu1 %v3217_v17  ;;  %v3288_v17 = vld [vmem:[%s4888_s1 + $0x18c] ss:$16 sps:$4 sm:$0xff]  }
  0x22   :  { %982 = vmatpush1.bf16.msra.mxu0 %v3721_v48 }
  0x23   :  { %495 = vmatpush1.bf16.msra.mxu1 %v3219_v18  ;;  %983 = vmatprep.subr.bf16.mxu0 %v3730_v50  ;;  %v3286_v18 = vld [vmem:[%s4888_s1 + $0x188] ss:$16 sps:$4 sm:$0xff]  }
  0x24   :  { %496 = vmatprep.subr.bf16.mxu1 %v3220_v19  ;;  %v3291_v19 = vld [vmem:[%s4888_s1 + $0x1ac] ss:$16 sps:$4 sm:$0xff]  }
  0x26   :  { %984 = vmatpush1.bf16.msra.mxu0 %v3745_v53 }
  0x27   :  { %497 = vmatpush1.bf16.msra.mxu1 %v3222_v21  ;;  %985 = vmatprep.subr.bf16.mxu0 %v3758_v56  ;;  %v3289_v21 = vld [vmem:[%s4888_s1 + $0x1a8] ss:$16 sps:$4 sm:$0xff]  }
  0x28   :  { %498 = vmatprep.subr.bf16.mxu1 %v3223_v22  ;;  %v3297_v22 = vld [vmem:[%s4888_s1 + $0x1cc] ss:$16 sps:$4 sm:$0xff]  }
  0x2a   :  { %986 = vmatpush1.bf16.msra.mxu0 %v3769_v58 }
  0x2b   :  { %499 = vmatpush1.bf16.msra.mxu1 %v3225_v23  ;;  %987 = vmatprep.subr.bf16.mxu0 %v3778_v60  ;;  %v3295_v23 = vld [vmem:[%s4888_s1 + $0x1c8] ss:$16 sps:$4 sm:$0xff]  }
  0x2c   :  { %500 = vmatprep.subr.bf16.mxu1 %v3226_v24  ;;  %v3300_v24 = vld [vmem:[%s4888_s1 + $0x1ec] ss:$16 sps:$4 sm:$0xff]  }
  0x2e   :  { %988 = vmatpush1.bf16.msra.mxu0 %v3793_v63 }
  0x2f   :  { %501 = vmatpush1.bf16.msra.mxu1 %v3228_v25  ;;  %1091 = vmatprep.subr.bf16.mxu0 %v3632_v29  ;;  %v3298_v25 = vld [vmem:[%s4888_s1 + $0x1e8] ss:$16 sps:$4 sm:$0xff]  }
  0x30   :  { %502 = vmatprep.subr.bf16.mxu1 %v3229_v26  ;;  %v3902_v26 = vld [vmem:[%s4890_s2 + $0xc] ss:$16 sps:$4 sm:$0xff]  }
  0x33   :  { %503 = vmatpush1.bf16.msra.mxu1 %v3231_v27  ;;  %v3908_v27 = vld [vmem:[%s4890_s2 + $0x8] ss:$16 sps:$4 sm:$0xff]  }
  0x34   :  { %504 = vmatprep.subr.bf16.mxu1 %v3232_v28  ;;  %v3914_v28 = vld [vmem:[%s4890_s2 + $0x2c] ss:$16 sps:$4 sm:$0xff]  }
  0x37   :  { %505 = vmatpush1.bf16.msra.mxu1 %v3234_v32  ;;  %v3921_v32 = vld [vmem:[%s4890_s2 + $0x28] ss:$16 sps:$4 sm:$0xff]  }
  0x38   :  { %506 = vmatprep.subr.bf16.mxu1 %v3235_v33  ;;  %v3928_v33 = vld [vmem:[%s4890_s2 + $0x4c] ss:$16 sps:$4 sm:$0xff]  }
  0x3b   :  { %507 = vmatpush1.bf16.msra.mxu1 %v3237_v36  ;;  %v3934_v36 = vld [vmem:[%s4890_s2 + $0x48] ss:$16 sps:$4 sm:$0xff]  }
  0x3c   :  { %508 = vmatprep.subr.bf16.mxu1 %v3238_v37  ;;  %v3940_v37 = vld [vmem:[%s4890_s2 + $0x6c] ss:$16 sps:$4 sm:$0xff]  }
  0x3f   :  { %509 = vmatpush1.bf16.msra.mxu1 %v3240_v40  ;;  %v3946_v40 = vld [vmem:[%s4890_s2 + $0x68] ss:$16 sps:$4 sm:$0xff]  }
  0x40   :  { %551 = vmatprep.subr.bf16.mxu1 %v3246_v41  ;;  %v3952_v41 = vld [vmem:[%s4890_s2 + $0x8c] ss:$16 sps:$4 sm:$0xff]  }
  0x42   :  { %511 = vmatmul.mubr.bf16.vlgmr.msra.gmra.mrb[0].mxu1 %v3697_v43 }
  0x43   :  { %552 = vmatpush1.bf16.msra.mxu1 %v3244_v45  ;;  %520 = vmatprep.mubr.bf16.mxu1 %v3710_v46  ;;  %v3964_v45 = vld [vmem:[%s4890_s2 + $0xac] ss:$16 sps:$4 sm:$0xff]  }
  0x44   :  { %553 = vmatprep.subr.bf16.mxu1 %v3249_v47  ;;  %v3976_v47 = vld [vmem:[%s4890_s2 + $0xcc] ss:$16 sps:$4 sm:$0xff]  }
  0x47   :  { %554 = vmatpush1.bf16.msra.mxu1 %v3247_v49  ;;  %v3982_v49 = vld [vmem:[%s4890_s2 + $0xc8] ss:$16 sps:$4 sm:$0xff]  }
  0x48   :  { %555 = vmatprep.subr.bf16.mxu1 %v3252_v51  ;;  %v3988_v51 = vld [vmem:[%s4890_s2 + $0xec] ss:$16 sps:$4 sm:$0xff]  }
  0x4a   :  { %521 = vmatmul.mubr.bf16.gmra.mrb[4].mxu1 %v3740_v52 }
  0x4b   :  { %556 = vmatpush1.bf16.msra.mxu1 %v3250_v54  ;;  %530 = vmatprep.mubr.bf16.mxu1 %v3753_v55  ;;  %v98_v54 = vlaneseq }
  0x4c   :  { %557 = vmatprep.subr.bf16.mxu1 %v3255_v57 }
  0x4f   :  { %558 = vmatpush1.bf16.msra.mxu1 %v3253_v59  ;;  %v96_v59 = vld [vmem:[%s4891_s3] sm:$0xf] }
  0x50   :  { %559 = vmatprep.subr.bf16.mxu1 %v3258_v61 }
  0x52   :  { %531 = vmatmul.mubr.bf16.gmra.mrb[8].mxu1 %v3788_v62 }
  0x53   :  { %560 = vmatpush1.bf16.msra.mxu1 %v3256_v0  ;;  %540 = vmatprep.mubr.bf16.mxu1 %v3801_v1 }
  0x54   :  { %561 = vmatprep.subr.bf16.mxu1 %v3261_v2 }
  0x57   :  { %562 = vmatpush1.bf16.msra.mxu1 %v3259_v3 }
  0x58   :  { %563 = vmatprep.subr.bf16.mxu1 %v3264_v4 }
  0x5a   :  { %541 = vmatmul.mubr.bf16.gmra.mrb[12].mxu1 %v3294_v5 }
  0x5b   :  { %564 = vmatpush1.bf16.msra.mxu1 %v3262_v6  ;;  %583 = vmatprep.mubr.bf16.mxu1 %v3583_v13  ;;  %v3279_v13 = vld [vmem:[%s4888_s1 + $0x14c] ss:$16 sps:$4 sm:$0xff]  }
  0x5c   :  { %565 = vmatprep.subr.bf16.mxu1 %v3267_v7 }
  0x5f   :  { %566 = vmatpush1.bf16.msra.mxu1 %v3265_v8 }
  0x60   :  { %567 = vmatprep.subr.bf16.mxu1 %v3270_v9 }
  0x63   :  { %568 = vmatpush1.bf16.msra.mxu1 %v3268_v10 }
  0x64   :  { %569 = vmatprep.subr.bf16.mxu1 %v3273_v11 }
  0x67   :  { %570 = vmatpush1.bf16.msra.mxu1 %v3271_v12 }
  0x68   :  { %571 = vmatprep.subr.bf16.mxu1 %v3279_v13 }
  0x6b   :  { %572 = vmatpush1.bf16.msra.mxu1 %v3277_v14 }
  0x6c   :  { %573 = vmatprep.subr.bf16.mxu1 %v3282_v15 }
  0x6f   :  { %574 = vmatpush1.bf16.msra.mxu1 %v3280_v16 }
  0x70   :  { %575 = vmatprep.subr.bf16.mxu1 %v3288_v17 }
  0x73   :  { %576 = vmatpush1.bf16.msra.mxu1 %v3286_v18 }
  0x74   :  { %577 = vmatprep.subr.bf16.mxu1 %v3291_v19 }
  0x77   :  { %578 = vmatpush1.bf16.msra.mxu1 %v3289_v21 }
  0x78   :  { %579 = vmatprep.subr.bf16.mxu1 %v3297_v22 }
  0x7b   :  { %580 = vmatpush1.bf16.msra.mxu1 %v3295_v23 }
  0x7c   :  { %581 = vmatprep.subr.bf16.mxu1 %v3300_v24 }
  0x7f   :  { %582 = vmatpush1.bf16.msra.mxu1 %v3298_v25 }
  0x80   :  { %855 = vmatprep.subr.bf16.mxu1 %v3632_v29 }
  0x82   :  { %584 = vmatmul.mubr.bf16.vlgmr.msra.gmra.mrb[16].mxu1 %v3697_v43  ;;  %v3958_v43 = vld [vmem:[%s4890_s2 + $0x88] ss:$16 sps:$4 sm:$0xff]  }
  0x83   :  { %856 = vmatpush1.bf16.msra.mxu1 %v3637_v30  ;;  %593 = vmatprep.mubr.bf16.mxu1 %v3710_v46  ;;  %v3970_v46 = vld [vmem:[%s4890_s2 + $0xa8] ss:$16 sps:$4 sm:$0xff]  }
  0x84   :  { %857 = vmatprep.subr.bf16.mxu1 %v3642_v31 }
  0x87   :  { %858 = vmatpush1.bf16.msra.mxu1 %v3656_v34 }
  0x88   :  { %859 = vmatprep.subr.bf16.mxu1 %v3661_v35 }
  0x8a   :  { %594 = vmatmul.mubr.bf16.gmra.mrb[20].mxu1 %v3740_v52  ;;  %v3994_v52 = vld [vmem:[%s4890_s2 + $0xe8] ss:$16 sps:$4 sm:$0xff]  }
  0x8b   :  { %860 = vmatpush1.bf16.msra.mxu1 %v3674_v38  ;;  %603 = vmatprep.mubr.bf16.mxu1 %v3753_v55  ;;  %v99_v55 = vshrl.u32 %v98_v54, 7 }
  0x8c   :  { %861 = vmatprep.subr.bf16.mxu1 %v3679_v39 }
  0x8d   :  { %v100_v57 = vsub.s32 0, %v99_v55  ;;  %v104_v61 = vsub.s32 1, %v99_v55 }
  0x8f   :  { %862 = vmatpush1.bf16.msra.mxu1 %v3692_v42  ;;  %v4026_v2 = vrot.slane %v96_v59, %v104_v61 }
  0x90   :  { %863 = vmatprep.subr.bf16.mxu1 %v3702_v44 }
  0x92   :  { %604 = vmatmul.mubr.bf16.gmra.mrb[24].mxu1 %v3788_v62  ;;  %v4020_v62 = vrot.slane %v96_v59, %v100_v57 }
  0x93   :  { %864 = vmatpush1.bf16.msra.mxu1 %v3721_v48  ;;  %613 = vmatprep.mubr.bf16.mxu1 %v3801_v1 }
  0x94   :  { %865 = vmatprep.subr.bf16.mxu1 %v3730_v50 }
  0x97   :  { %866 = vmatpush1.bf16.msra.mxu1 %v3745_v53 }
  0x98   :  { %867 = vmatprep.subr.bf16.mxu1 %v3758_v56 }
  0x9a   :  { %614 = vmatmul.mubr.bf16.gmra.mrb[28].mxu1 %v3294_v5 }
  0x9b   :  { %868 = vmatpush1.bf16.msra.mxu1 %v3769_v58  ;;  %887 = vmatprep.mubr.bf16.mxu1 %v4895_v20 }
  0x9c   :  { %869 = vmatprep.subr.bf16.mxu1 %v3778_v60 }
  0x9f   :  { %870 = vmatpush1.bf16.msra.mxu1 %v3793_v63 }
  0xa0   :  { %896 = vmatprep.subr.bf16.mxu1 %v3902_v26 }
  0xa2   :  { %888 = vmatmul.mubr.bf16.vlgmr.msra.gmra.mrb[32].mxu1 %v4895_v20 }
  0xa3   :  { %897 = vmatpush1.bf16.msra.mxu1 %v3908_v27  ;;  %928 = vmatprep.mubr.bf16.mxu1 %v4895_v20 }
  0xa4   :  { %898 = vmatprep.subr.bf16.mxu1 %v3914_v28 }
  0xa7   :  { %899 = vmatpush1.bf16.msra.mxu1 %v3921_v32 }
  0xa8   :  { %900 = vmatprep.subr.bf16.mxu1 %v3928_v33 }
  0xab   :  { %901 = vmatpush1.bf16.msra.mxu1 %v3934_v36 }
  0xac   :  { %902 = vmatprep.subr.bf16.mxu1 %v3940_v37 }
  0xaf   :  { %903 = vmatpush1.bf16.msra.mxu1 %v3946_v40 }
  0xb0   :  { %904 = vmatprep.subr.bf16.mxu1 %v3952_v41 }
  0xb3   :  { %905 = vmatpush1.bf16.msra.mxu1 %v3958_v43 }
  0xb4   :  { %906 = vmatprep.subr.bf16.mxu1 %v3964_v45 }
  0xb7   :  { %907 = vmatpush1.bf16.msra.mxu1 %v3970_v46 }
  0xb8   :  { %908 = vmatprep.subr.bf16.mxu1 %v3976_v47 }
  0xbb   :  { %909 = vmatpush1.bf16.msra.mxu1 %v3982_v49 }
  0xbc   :  { %910 = vmatprep.subr.bf16.mxu1 %v3988_v51 }
  0xbf   :  { %911 = vmatpush1.bf16.msra.mxu1 %v3994_v52 }
  0xc0   :  { %1014 = vmatprep.subr.bf16.mxu1 %v3902_v26 }
  0xc2   :  { %929 = vmatmul.mubr.bf16.vlgmr.msra.gmra.mrb[36].mxu1 %v4895_v20 }
  0xc3   :  { %1015 = vmatpush1.bf16.msra.mxu1 %v3908_v27  ;;  %1046 = vmatprep.mubr.bf16.mxu1 %v4895_v20 }
  0xc4   :  { %1016 = vmatprep.subr.bf16.mxu1 %v3914_v28 }
  0xc7   :  { %1017 = vmatpush1.bf16.msra.mxu1 %v3921_v32 }
  0xc8   :  { %1018 = vmatprep.subr.bf16.mxu1 %v3928_v33 }
  0xcb   :  { %1019 = vmatpush1.bf16.msra.mxu1 %v3934_v36 }
  0xcc   :  { %1020 = vmatprep.subr.bf16.mxu1 %v3940_v37 }
  0xcf   :  { %1021 = vmatpush1.bf16.msra.mxu1 %v3946_v40 }
  0xd0   :  { %1022 = vmatprep.subr.bf16.mxu1 %v3952_v41 }
  0xd3   :  { %1023 = vmatpush1.bf16.msra.mxu1 %v3958_v43 }
  0xd4   :  { %1024 = vmatprep.subr.bf16.mxu1 %v3964_v45 }
  0xd7   :  { %1025 = vmatpush1.bf16.msra.mxu1 %v3970_v46 }
  0xd8   :  { %1026 = vmatprep.subr.bf16.mxu1 %v3976_v47 }
  0xdb   :  { %1027 = vmatpush1.bf16.msra.mxu1 %v3982_v49 }
  0xdc   :  { %1028 = vmatprep.subr.bf16.mxu1 %v3988_v51 }
  0xdf   :  { %1029 = vmatpush1.bf16.msra.mxu1 %v3994_v52 }
  0xe0   :  { %1132 = vmatprep.subr.bf16.mxu1 %v3902_v26 }
 0x115   :  { %v4022_v0 = vpop.f32.mrb[0].mxu1 }
 0x116   :  { %v4024_v1 = vpop.f32.mrb[1].mxu1 }
 0x117   :  { %v516_v3 = vpop.f32.mrb[2].mxu1 }
 0x118   :  { %v4029_v4 = vadd.f32 %v516_v3, %v4020_v62  ;;  %v518_v5 = vpop.f32.mrb[3].mxu1 }
 0x119   :  { %v4032_v6 = vadd.f32 %v518_v5, %v4026_v2 }
 0x11d   :  { %v522_v7 = vpop.f32.mrb[4].mxu1 }
 0x11e   :  { %v4035_v8 = vadd.f32 %v522_v7, %v4020_v62  ;;  %v524_v9 = vpop.f32.mrb[5].mxu1 }
 0x11f   :  { %v4038_v10 = vadd.f32 %v524_v9, %v4026_v2  ;;  %v526_v11 = vpop.f32.mrb[6].mxu1  ;;  %v108_v9 = vsub.s32 2, %v99_v55 }
 0x120   :  { %v4041_v12 = vadd.f32 %v526_v11, %v4020_v62  ;;  %v528_v13 = vpop.f32.mrb[7].mxu1  ;;  %v112_v11 = vsub.s32 3, %v99_v55 }
 0x121   :  { %v4044_v14 = vadd.f32 %v528_v13, %v4026_v2  ;;  %v109_v13 = vrot.slane %v96_v59, %v108_v9 }
 0x122   :  { %4897 = vst [vmem:[#allocation3_spill] sm:$0xff] %v4041_v12 }
 0x123   :  { %4898 = vst [vmem:[#allocation4_spill] sm:$0xff] %v4044_v14 }
 0x125   :  { %v532_v15 = vpop.f32.mrb[8].mxu1 }
 0x126   :  { %v4047_v16 = vadd.f32 %v532_v15, %v4020_v62  ;;  %v534_v17 = vpop.f32.mrb[9].mxu1 }
 0x127   :  { %v4050_v18 = vadd.f32 %v534_v17, %v4026_v2  ;;  %v536_v19 = vpop.f32.mrb[10].mxu1 }
 0x128   :  { %4899 = vst [vmem:[#allocation5_spill] sm:$0xff] %v4047_v16  ;;  %v4053_v21 = vadd.f32 %v536_v19, %v4020_v62  ;;  %v538_v22 = vpop.f32.mrb[11].mxu1  ;;  %v113_v19 = vrot.slane %v96_v59, %v112_v11 }
 0x129   :  { %4900 = vst [vmem:[#allocation6_spill] sm:$0xff] %v4050_v18  ;;  %v4056_v23 = vadd.f32 %v538_v22, %v4026_v2 }
 0x12a   :  { %4901 = vst [vmem:[#allocation7_spill] sm:$0xff] %v4053_v21 }
 0x12b   :  { %4902 = vst [vmem:[#allocation8_spill] sm:$0xff] %v4056_v23 }
 0x12d   :  { %v542_v24 = vpop.f32.mrb[12].mxu1 }
 0x12e   :  { %v4059_v25 = vadd.f32 %v542_v24, %v4020_v62  ;;  %v544_v54 = vpop.f32.mrb[13].mxu1 }
 0x12f   :  { %v4062_v57 = vadd.f32 %v544_v54, %v4026_v2  ;;  %v546_v61 = vpop.f32.mrb[14].mxu1 }
 0x130   :  { %4903 = vst [vmem:[#allocation9_spill] sm:$0xff] %v4059_v25  ;;  %v4065_v3 = vadd.f32 %v546_v61, %v4020_v62  ;;  %v548_v5 = vpop.f32.mrb[15].mxu1 }
 0x131   :  { %4904 = vst [vmem:[#allocation10_spill] sm:$0xff] %v4062_v57  ;;  %v4068_v7 = vadd.f32 %v548_v5, %v4026_v2 }
 0x132   :  { %4905 = vst [vmem:[#allocation11_spill] sm:$0xff] %v4065_v3 }
 0x133   :  { %4906 = vst [vmem:[#allocation12_spill] sm:$0xff] %v4068_v7 }
 0x155   :  { %v585_v15 = vpop.f32.mrb[16].mxu1 }
 0x156   :  { %v587_v17 = vpop.f32.mrb[17].mxu1 }
 0x157   :  { %v589_v22 = vpop.f32.mrb[18].mxu1  ;;  %v588_v12 = vadd.f32 %v587_v17, %v113_v19 }
 0x158   :  { %v4070_v24 = vadd.f32 %v589_v22, %v109_v13  ;;  %v591_v20 = vpop.f32.mrb[19].mxu1 }
 0x159   :  { %v4072_v54 = vadd.f32 %v591_v20, %v113_v19 }
 0x15d   :  { %v595_v57 = vpop.f32.mrb[20].mxu1 }
 0x15e   :  { %v4074_v25 = vadd.f32 %v595_v57, %v109_v13  ;;  %v597_v61 = vpop.f32.mrb[21].mxu1 }
 0x15f   :  { %v4076_v3 = vadd.f32 %v597_v61, %v113_v19  ;;  %v599_v5 = vpop.f32.mrb[22].mxu1 }
 0x160   :  { %v4078_v7 = vadd.f32 %v599_v5, %v109_v13  ;;  %v601_v55 = vpop.f32.mrb[23].mxu1 }
 0x161   :  { %v4080_v9 = vadd.f32 %v601_v55, %v113_v19 }
 0x162   :  { %4907 = vst [vmem:[#allocation13_spill] sm:$0xff] %v4078_v7 }
 0x163   :  { %4908 = vst [vmem:[#allocation14_spill] sm:$0xff] %v4080_v9 }
 0x165   :  { %v605_v23 = vpop.f32.mrb[24].mxu1 }
 0x166   :  { %v4082_v59 = vadd.f32 %v605_v23, %v109_v13  ;;  %v607_v11 = vpop.f32.mrb[25].mxu1 }
 0x167   :  { %v4084_v22 = vadd.f32 %v607_v11, %v113_v19  ;;  %v609_v20 = vpop.f32.mrb[26].mxu1  ;;  %v513_v11 = vadd.f32 %v4022_v0, %v4020_v62 }
 0x168   :  { %4909 = vst [vmem:[#allocation15_spill] sm:$0xff] %v4082_v59  ;;  %v4086_v21 = vadd.f32 %v609_v20, %v109_v13  ;;  %v611_v57 = vpop.f32.mrb[27].mxu1  ;;  %v515_v20 = vadd.f32 %v4024_v1, %v4026_v2 }
 0x169   :  { %4910 = vst [vmem:[#allocation16_spill] sm:$0xff] %v4084_v22  ;;  %v4088_v18 = vadd.f32 %v611_v57, %v113_v19 }
 0x16a   :  { %4911 = vst [vmem:[#allocation17_spill] sm:$0xff] %v4086_v21 }
 0x16b   :  { %4912 = vst [vmem:[#allocation18_spill] sm:$0xff] %v4088_v18 }
 0x16d   :  { %v615_v61 = vpop.f32.mrb[28].mxu1 }
 0x16e   :  { %v4090_v16 = vadd.f32 %v615_v61, %v109_v13  ;;  %v617_v5 = vpop.f32.mrb[29].mxu1 }
 0x16f   :  { %v4092_v14 = vadd.f32 %v617_v5, %v113_v19  ;;  %v619_v55 = vpop.f32.mrb[30].mxu1  ;;  %v4916_v19 = vmov 0  }
 0x170   :  { %4913 = vst [vmem:[#allocation19_spill] sm:$0xff] %v4090_v16  ;;  %v4094_v9 = vadd.f32 %v619_v55, %v109_v13  ;;  %v621_v23 = vpop.f32.mrb[31].mxu1 }
 0x171   :  { %4914 = vst [vmem:[#allocation20_spill] sm:$0xff] %v4092_v14  ;;  %v586_v14 = vadd.f32 %v585_v15, %v109_v13 }
 0x172   :  { %4915 = vst [vmem:[#allocation21_spill] sm:$0xff] %v4094_v9 }
 0x175   :  { %v889_v21 = vpop.f32.mrb[32].mxu1 }
 0x176   :  { %v937_v22 = vadd.f32 %v889_v21, %v513_v11  ;;  %v891_v57 = vpop.f32.mrb[33].mxu1 }
 0x177   :  { %v938_v18 = vadd.f32 %v891_v57, %v515_v20  ;;  %v893_v59 = vpop.f32.mrb[34].mxu1 }
 0x178   :  { %v894_v61 = vpop.f32.mrb[35].mxu1  ;;  %v2525_v7 = vmul.f32 -1.442695, %v937_v22 }
 0x179   :  { %v2526_v16 = vmul.f32 -1.442695, %v938_v18 }
 0x17b   :  { %3349 = vpow2.f32 %v2526_v16 }
 0x17c   :  { %3351 = vpow2.f32 %v2525_v7 }
 0x185   :  { %v3350_v5 = vpop.eup %3349 }
 0x186   :  { %v3352_v55 = vpop.eup %3351  ;;  %v950_v9 = vadd.f32 1.0, %v3350_v5 }
 0x187   :  { %v944_v23 = vadd.f32 1.0, %v3352_v55 }
 0x188   :  { %3353 = vrcp.f32 %v950_v9 }
 0x189   :  { %3355 = vrcp.f32 %v944_v23 }
 0x192   :  { %v3354_v18 = vpop.eup %3353 }
 0x193   :  { %v3356_v16 = vpop.eup %3355  ;;  %v960_v22 = vmul.f32 0.0, %v3354_v18 }
 0x195   :  { %v930_v62 = vpop.f32.mrb[36].mxu1 }
 0x196   :  { %v939_v0 = vadd.f32 %v930_v62, %v586_v14  ;;  %v932_v1 = vpop.f32.mrb[37].mxu1 }
 0x197   :  { %v940_v2 = vadd.f32 %v932_v1, %v588_v12  ;;  %v934_v21 = vpop.f32.mrb[38].mxu1 }
 0x198   :  { %3357 = vtanh.f32 %v939_v0  ;;  %v935_v59 = vpop.f32.mrb[39].mxu1 }
 0x199   :  { %v2527_v11 = vmul.f32 -1.442695, %v940_v2 }
 0x19b   :  { %3359 = vpow2.f32 %v2527_v11 }
 0x1a2   :  { %v3358_v7 = vpop.eup %3357 }
 0x1a3   :  { %v961_v20 = vmul.f32 %v3358_v7, %v3356_v16 }
 0x1a5   :  { %v3360_v57 = vpop.eup %3359  ;;  %v4100_v61 = vadd.f32 %v961_v20, %v960_v22 }
 0x1a6   :  { %v957_v13 = vadd.f32 1.0, %v3360_v57 }
 0x1a7   :  { %3361 = vtanh.f32 %v4100_v61 }
 0x1a8   :  { %3363 = vrcp.f32 %v957_v13 }
 0x1b1   :  { %v3362_v14 = vpop.eup %3361 }
 0x1b2   :  { %v3364_v15 = vpop.eup %3363 }
 0x1b3   :  { %v964_v12 = vmul.f32 %v3364_v15, %v3362_v14 }
 0x1b5   :  { %v972_v17 = vpack.c.bf16 %v964_v12, %v964_v12 }
 0x1b7   :  { %1006 = vmatmul.mubr.bf16.vlgmr.msra.gmra.mrb[0].mxu0 %v972_v17  ;;  %1047 = vmatmul.mubr.bf16.vlgmr.msra.gmra.mrb[40].mxu1 %v972_v17 }
 0x1b8   :  { %1092 = vmatpush1.bf16.msra.mxu0 %v3637_v30  ;;  %1133 = vmatpush1.bf16.msra.mxu1 %v3908_v27 }
 0x1b9   :  { %1093 = vmatprep.subr.bf16.mxu0 %v3642_v31  ;;  %1134 = vmatprep.subr.bf16.mxu1 %v3914_v28 }
 0x1ba   :  { %1123 = vmatprep.mubr.bf16.mxu0 %v4916_v19  ;;  %1164 = vmatprep.mubr.bf16.mxu1 %v4916_v19 }
 0x1bc   :  { %1094 = vmatpush1.bf16.msra.mxu0 %v3656_v34  ;;  %1135 = vmatpush1.bf16.msra.mxu1 %v3921_v32 }
 0x1bd   :  { %1095 = vmatprep.subr.bf16.mxu0 %v3661_v35  ;;  %1136 = vmatprep.subr.bf16.mxu1 %v3928_v33 }
 0x1c0   :  { %1096 = vmatpush1.bf16.msra.mxu0 %v3674_v38  ;;  %1137 = vmatpush1.bf16.msra.mxu1 %v3934_v36 }
 0x1c1   :  { %1097 = vmatprep.subr.bf16.mxu0 %v3679_v39  ;;  %1138 = vmatprep.subr.bf16.mxu1 %v3940_v37 }
 0x1c4   :  { %1098 = vmatpush1.bf16.msra.mxu0 %v3692_v42  ;;  %1139 = vmatpush1.bf16.msra.mxu1 %v3946_v40 }
 0x1c5   :  { %1099 = vmatprep.subr.bf16.mxu0 %v3702_v44  ;;  %1140 = vmatprep.subr.bf16.mxu1 %v3952_v41 }
 0x1c8   :  { %1100 = vmatpush1.bf16.msra.mxu0 %v3721_v48  ;;  %1141 = vmatpush1.bf16.msra.mxu1 %v3958_v43 }
 0x1c9   :  { %1101 = vmatprep.subr.bf16.mxu0 %v3730_v50  ;;  %1142 = vmatprep.subr.bf16.mxu1 %v3964_v45 }
 0x1cc   :  { %1102 = vmatpush1.bf16.msra.mxu0 %v3745_v53  ;;  %1143 = vmatpush1.bf16.msra.mxu1 %v3970_v46 }
 0x1cd   :  { %1103 = vmatprep.subr.bf16.mxu0 %v3758_v56  ;;  %1144 = vmatprep.subr.bf16.mxu1 %v3976_v47 }
 0x1d0   :  { %1104 = vmatpush1.bf16.msra.mxu0 %v3769_v58  ;;  %1145 = vmatpush1.bf16.msra.mxu1 %v3982_v49 }
 0x1d1   :  { %1105 = vmatprep.subr.bf16.mxu0 %v3778_v60  ;;  %1146 = vmatprep.subr.bf16.mxu1 %v3988_v51 }
 0x1d4   :  { %1106 = vmatpush1.bf16.msra.mxu0 %v3793_v63  ;;  %1147 = vmatpush1.bf16.msra.mxu1 %v3994_v52 }
 0x1d5   :  { %1209 = vmatprep.subr.bf16.mxu0 %v3632_v29  ;;  %1250 = vmatprep.subr.bf16.mxu1 %v3902_v26 }
 0x28a   :  { %v1007_v9 = vpop.f32.mrb[0].mxu0  ;;  %v1048_v5 = vpop.f32.mrb[40].mxu1 }
 0x28b   :  { %v1055_v55 = vadd.f32 %v1007_v9, %v4029_v4  ;;  %v1057_v23 = vadd.f32 %v1048_v5, %v4070_v24  ;;  %v1009_v62 = vpop.f32.mrb[1].mxu0  ;;  %v1050_v0 = vpop.f32.mrb[41].mxu1 }
 0x28c   :  { %v1056_v1 = vadd.f32 %v1009_v62, %v4032_v6  ;;  %v1058_v2 = vadd.f32 %v1050_v0, %v4072_v54  ;;  %v1011_v21 = vpop.f32.mrb[2].mxu0  ;;  %v1052_v59 = vpop.f32.mrb[42].mxu1 }
 0x28d   :  { %v2528_v11 = vmul.f32 -1.442695, %v1055_v55  ;;  %v1012_v18 = vpop.f32.mrb[3].mxu0  ;;  %v1053_v16 = vpop.f32.mrb[43].mxu1 }
 0x28e   :  { %v2529_v7 = vmul.f32 -1.442695, %v1056_v1  ;;  %v2530_v22 = vmul.f32 -1.442695, %v1058_v2 }
 0x28f   :  { %3365 = vpow2.f32 %v2528_v11 }
 0x290   :  { %3367 = vpow2.f32 %v2529_v7 }
 0x291   :  { %3369 = vpow2.f32 %v2530_v22 }
 0x292   :  { %3371 = vtanh.f32 %v1057_v23 }
 0x299   :  { %v3366_v20 = vpop.eup %3365 }
 0x29a   :  { %v3368_v57 = vpop.eup %3367  ;;  %v1062_v4 = vadd.f32 1.0, %v3366_v20 }
 0x29b   :  { %v1068_v24 = vadd.f32 1.0, %v3368_v57  ;;  %v3370_v6 = vpop.eup %3369 }
 0x29c   :  { %3373 = vrcp.f32 %v1062_v4  ;;  %v3372_v13 = vpop.eup %3371  ;;  %v1075_v12 = vadd.f32 1.0, %v3370_v6 }
 0x29d   :  { %3375 = vrcp.f32 %v1068_v24 }
 0x29e   :  { %3377 = vrcp.f32 %v1075_v12 }
 0x2a6   :  { %v3374_v54 = vpop.eup %3373 }
 0x2a7   :  { %v3376_v14 = vpop.eup %3375  ;;  %v1079_v15 = vmul.f32 %v3374_v54, %v3372_v13 }
 0x2a8   :  { %v1078_v17 = vmul.f32 %v3376_v14, %v4100_v61  ;;  %v3378_v5 = vpop.eup %3377 }
 0x2aa   :  { %v4142_v9 = vadd.f32 %v1079_v15, %v1078_v17 }
 0x2ac   :  { %3379 = vtanh.f32 %v4142_v9 }
 0x2b6   :  { %v3380_v55 = vpop.eup %3379 }
 0x2b7   :  { %v1082_v62 = vmul.f32 %v3380_v55, %v3378_v5 }
 0x2b9   :  { %v1090_v23 = vpack.c.bf16 %v1082_v62, %v1082_v62 }
 0x2bb   :  { %1124 = vmatmul.mubr.bf16.vlgmr.msra.gmra.mrb[4].mxu0 %v1090_v23  ;;  %1165 = vmatmul.mubr.bf16.vlgmr.msra.gmra.mrb[44].mxu1 %v1090_v23 }
 0x2bc   :  { %1210 = vmatpush1.bf16.msra.mxu0 %v3637_v30  ;;  %1251 = vmatpush1.bf16.msra.mxu1 %v3908_v27 }
 0x2bd   :  { %1211 = vmatprep.subr.bf16.mxu0 %v3642_v31  ;;  %1252 = vmatprep.subr.bf16.mxu1 %v3914_v28 }
 0x2be   :  { %1241 = vmatprep.mubr.bf16.mxu0 %v4916_v19  ;;  %1282 = vmatprep.mubr.bf16.mxu1 %v4916_v19 }
 0x2c0   :  { %1212 = vmatpush1.bf16.msra.mxu0 %v3656_v34  ;;  %1253 = vmatpush1.bf16.msra.mxu1 %v3921_v32 }
 0x2c1   :  { %1213 = vmatprep.subr.bf16.mxu0 %v3661_v35  ;;  %1254 = vmatprep.subr.bf16.mxu1 %v3928_v33 }
 0x2c4   :  { %1214 = vmatpush1.bf16.msra.mxu0 %v3674_v38  ;;  %1255 = vmatpush1.bf16.msra.mxu1 %v3934_v36 }
 0x2c5   :  { %1215 = vmatprep.subr.bf16.mxu0 %v3679_v39  ;;  %1256 = vmatprep.subr.bf16.mxu1 %v3940_v37 }
 0x2c8   :  { %1216 = vmatpush1.bf16.msra.mxu0 %v3692_v42  ;;  %1257 = vmatpush1.bf16.msra.mxu1 %v3946_v40 }
 0x2c9   :  { %1217 = vmatprep.subr.bf16.mxu0 %v3702_v44  ;;  %1258 = vmatprep.subr.bf16.mxu1 %v3952_v41 }
 0x2cc   :  { %1218 = vmatpush1.bf16.msra.mxu0 %v3721_v48  ;;  %1259 = vmatpush1.bf16.msra.mxu1 %v3958_v43 }
 0x2cd   :  { %1219 = vmatprep.subr.bf16.mxu0 %v3730_v50  ;;  %1260 = vmatprep.subr.bf16.mxu1 %v3964_v45 }
 0x2d0   :  { %1220 = vmatpush1.bf16.msra.mxu0 %v3745_v53  ;;  %1261 = vmatpush1.bf16.msra.mxu1 %v3970_v46 }
 0x2d1   :  { %1221 = vmatprep.subr.bf16.mxu0 %v3758_v56  ;;  %1262 = vmatprep.subr.bf16.mxu1 %v3976_v47 }
 0x2d4   :  { %1222 = vmatpush1.bf16.msra.mxu0 %v3769_v58  ;;  %1263 = vmatpush1.bf16.msra.mxu1 %v3982_v49 }
 0x2d5   :  { %1223 = vmatprep.subr.bf16.mxu0 %v3778_v60  ;;  %1264 = vmatprep.subr.bf16.mxu1 %v3988_v51 }
 0x2d8   :  { %1224 = vmatpush1.bf16.msra.mxu0 %v3793_v63  ;;  %1265 = vmatpush1.bf16.msra.mxu1 %v3994_v52 }
 0x2d9   :  { %1327 = vmatprep.subr.bf16.mxu0 %v3632_v29  ;;  %1368 = vmatprep.subr.bf16.mxu1 %v3902_v26 }
 0x38e   :  { %v1125_v61 = vpop.f32.mrb[4].mxu0  ;;  %v1166_v0 = vpop.f32.mrb[44].mxu1 }
 0x38f   :  { %v1173_v1 = vadd.f32 %v1125_v61, %v4035_v8  ;;  %v1175_v2 = vadd.f32 %v1166_v0, %v4074_v25  ;;  %v1127_v21 = vpop.f32.mrb[5].mxu0  ;;  %v1168_v59 = vpop.f32.mrb[45].mxu1 }
 0x390   :  { %v1174_v11 = vadd.f32 %v1127_v21, %v4038_v10  ;;  %v1176_v18 = vadd.f32 %v1168_v59, %v4076_v3  ;;  %v1129_v16 = vpop.f32.mrb[6].mxu0  ;;  %v1170_v7 = vpop.f32.mrb[46].mxu1 }
 0x391   :  { %v2531_v22 = vmul.f32 -1.442695, %v1173_v1  ;;  %v1130_v20 = vpop.f32.mrb[7].mxu0  ;;  %v1171_v57 = vpop.f32.mrb[47].mxu1 }
 0x392   :  { %v2532_v29 = vmul.f32 -1.442695, %v1174_v11  ;;  %v2533_v4 = vmul.f32 -1.442695, %v1176_v18 }
 0x393   :  { %3381 = vpow2.f32 %v2531_v22 }
 0x394   :  { %3383 = vpow2.f32 %v2532_v29 }
 0x395   :  { %3385 = vpow2.f32 %v2533_v4 }
 0x396   :  { %3387 = vtanh.f32 %v1175_v2 }
 0x39d   :  { %v3382_v24 = vpop.eup %3381 }
 0x39e   :  { %v3384_v6 = vpop.eup %3383  ;;  %v1180_v8 = vadd.f32 1.0, %v3382_v24 }
 0x39f   :  { %v1186_v25 = vadd.f32 1.0, %v3384_v6  ;;  %v3386_v10 = vpop.eup %3385 }
 0x3a0   :  { %3389 = vrcp.f32 %v1180_v8  ;;  %v3388_v13 = vpop.eup %3387  ;;  %v1193_v15 = vadd.f32 1.0, %v3386_v10 }
 0x3a1   :  { %3391 = vrcp.f32 %v1186_v25 }
 0x3a2   :  { %3393 = vrcp.f32 %v1193_v15  ;;  %v4244_v15 = vld [vmem:[%s4890_s2 + $0x24] ss:$16 sps:$4 sm:$0xff]  }
 0x3aa   :  { %v3390_v3 = vpop.eup %3389 }
 0x3ab   :  { %v3392_v54 = vpop.eup %3391  ;;  %v1197_v14 = vmul.f32 %v3390_v3, %v3388_v13 }
 0x3ac   :  { %v1196_v12 = vmul.f32 %v3392_v54, %v4142_v9  ;;  %v3394_v5 = vpop.eup %3393 }
 0x3ae   :  { %v4184_v17 = vadd.f32 %v1197_v14, %v1196_v12  ;;  %v4237_v14 = vld [vmem:[%s4890_s2] ss:$16 sps:$4 sm:$0xff]  }
 0x3af   :  { %v4253_v12 = vld [vmem:[%s4890_s2 + $0x20] ss:$16 sps:$4 sm:$0xff]  }
 0x3b0   :  { %3395 = vtanh.f32 %v4184_v17 }
 0x3ba   :  { %v3396_v55 = vpop.eup %3395 }
 0x3bb   :  { %v1200_v62 = vmul.f32 %v3396_v55, %v3394_v5  ;;  %v4267_v5 = vld [vmem:[%s4890_s2 + $0x40] ss:$16 sps:$4 sm:$0xff]   ;;  %v4274_v55 = vld [vmem:[%s4890_s2 + $0x64] ss:$16 sps:$4 sm:$0xff]  }
 0x3bd   :  { %v1208_v23 = vpack.c.bf16 %v1200_v62, %v1200_v62  ;;  %v4281_v62 = vld [vmem:[%s4890_s2 + $0x60] ss:$16 sps:$4 sm:$0xff]  }
 0x3bf   :  { %1242 = vmatmul.mubr.bf16.vlgmr.msra.gmra.mrb[8].mxu0 %v1208_v23  ;;  %1283 = vmatmul.mubr.bf16.vlgmr.msra.gmra.mrb[48].mxu1 %v1208_v23  ;;  %v4288_v23 = vld [vmem:[%s4890_s2 + $0x84] ss:$16 sps:$4 sm:$0xff]  }
 0x3c0   :  { %1328 = vmatpush1.bf16.msra.mxu0 %v3637_v30  ;;  %1369 = vmatpush1.bf16.msra.mxu1 %v3908_v27  ;;  %v4222_v30 = vld [vmem:[%s4890_s2 + $0x4] ss:$16 sps:$4 sm:$0xff]  }
 0x3c1   :  { %1329 = vmatprep.subr.bf16.mxu0 %v3642_v31  ;;  %1370 = vmatprep.subr.bf16.mxu1 %v3914_v28 }
 0x3c2   :  { %1359 = vmatprep.mubr.bf16.mxu0 %v4916_v19  ;;  %1400 = vmatprep.mubr.bf16.mxu1 %v4916_v19 }
 0x3c4   :  { %1330 = vmatpush1.bf16.msra.mxu0 %v3656_v34  ;;  %1371 = vmatpush1.bf16.msra.mxu1 %v3921_v32 }
 0x3c5   :  { %1331 = vmatprep.subr.bf16.mxu0 %v3661_v35  ;;  %1372 = vmatprep.subr.bf16.mxu1 %v3928_v33  ;;  %v4917_v35 = vld [vmem:[#allocation3_spill] sm:$0xff] }
 0x3c8   :  { %1332 = vmatpush1.bf16.msra.mxu0 %v3674_v38  ;;  %1373 = vmatpush1.bf16.msra.mxu1 %v3934_v36 }
 0x3c9   :  { %1333 = vmatprep.subr.bf16.mxu0 %v3679_v39  ;;  %1374 = vmatprep.subr.bf16.mxu1 %v3940_v37  ;;  %v4918_v39 = vld [vmem:[#allocation13_spill] sm:$0xff] }
 0x3cc   :  { %1334 = vmatpush1.bf16.msra.mxu0 %v3692_v42  ;;  %1375 = vmatpush1.bf16.msra.mxu1 %v3946_v40 }
 0x3cd   :  { %1335 = vmatprep.subr.bf16.mxu0 %v3702_v44  ;;  %1376 = vmatprep.subr.bf16.mxu1 %v3952_v41 }
 0x3d0   :  { %1336 = vmatpush1.bf16.msra.mxu0 %v3721_v48  ;;  %1377 = vmatpush1.bf16.msra.mxu1 %v3958_v43 }
 0x3d1   :  { %1337 = vmatprep.subr.bf16.mxu0 %v3730_v50  ;;  %1378 = vmatprep.subr.bf16.mxu1 %v3964_v45  ;;  %v4919_v50 = vld [vmem:[#allocation4_spill] sm:$0xff] }
 0x3d4   :  { %1338 = vmatpush1.bf16.msra.mxu0 %v3745_v53  ;;  %1379 = vmatpush1.bf16.msra.mxu1 %v3970_v46 }
 0x3d5   :  { %1339 = vmatprep.subr.bf16.mxu0 %v3758_v56  ;;  %1380 = vmatprep.subr.bf16.mxu1 %v3976_v47  ;;  %v4920_v56 = vld [vmem:[#allocation14_spill] sm:$0xff] }
 0x3d8   :  { %1340 = vmatpush1.bf16.msra.mxu0 %v3769_v58  ;;  %1381 = vmatpush1.bf16.msra.mxu1 %v3982_v49 }
 0x3d9   :  { %1341 = vmatprep.subr.bf16.mxu0 %v3778_v60  ;;  %1382 = vmatprep.subr.bf16.mxu1 %v3988_v51 }
 0x3dc   :  { %1342 = vmatpush1.bf16.msra.mxu0 %v3793_v63  ;;  %1383 = vmatpush1.bf16.msra.mxu1 %v3994_v52 }
 0x3dd   :  { %1445 = vmatprep.subr.bf16.mxu0 %v4222_v30  ;;  %1486 = vmatprep.subr.bf16.mxu1 %v3902_v26 }
 0x492   :  { %v1243_v31 = vpop.f32.mrb[8].mxu0  ;;  %v1284_v34 = vpop.f32.mrb[48].mxu1 }
 0x493   :  { %v1291_v38 = vadd.f32 %v1243_v31, %v4917_v35  ;;  %v1293_v42 = vadd.f32 %v1284_v34, %v4918_v39  ;;  %v1245_v44 = vpop.f32.mrb[9].mxu0  ;;  %v1286_v48 = vpop.f32.mrb[49].mxu1  ;;  %v4295_v31 = vld [vmem:[%s4890_s2 + $0x80] ss:$16 sps:$4 sm:$0xff]   ;;  %v4302_v34 = vld [vmem:[%s4890_s2 + $0xa4] ss:$16 sps:$4 sm:$0xff]  }
 0x494   :  { %v1292_v53 = vadd.f32 %v1245_v44, %v4919_v50  ;;  %v1294_v9 = vadd.f32 %v1286_v48, %v4920_v56  ;;  %v1247_v61 = vpop.f32.mrb[10].mxu0  ;;  %v1288_v0 = vpop.f32.mrb[50].mxu1  ;;  %v4309_v35 = vld [vmem:[%s4890_s2 + $0xa0] ss:$16 sps:$4 sm:$0xff]  }
 0x495   :  { %v2534_v1 = vmul.f32 -1.442695, %v1291_v38  ;;  %v1248_v2 = vpop.f32.mrb[11].mxu0  ;;  %v1289_v21 = vpop.f32.mrb[51].mxu1  ;;  %v4316_v38 = vld [vmem:[%s4890_s2 + $0xc4] ss:$16 sps:$4 sm:$0xff]  }
 0x496   :  { %v2535_v59 = vmul.f32 -1.442695, %v1292_v53  ;;  %v2536_v11 = vmul.f32 -1.442695, %v1294_v9  ;;  %v4921_v44 = vld [vmem:[#allocation5_spill] sm:$0xff]  ;;  %v4922_v50 = vld [vmem:[#allocation15_spill] sm:$0xff] }
 0x497   :  { %3397 = vpow2.f32 %v2534_v1  ;;  %v4923_v9 = vld [vmem:[#allocation6_spill] sm:$0xff]  ;;  %v4924_v61 = vld [vmem:[#allocation16_spill] sm:$0xff] }
 0x498   :  { %3399 = vpow2.f32 %v2535_v59 }
 0x499   :  { %3401 = vpow2.f32 %v2536_v11 }
 0x49a   :  { %3403 = vtanh.f32 %v1293_v42 }
 0x4a1   :  { %v3398_v18 = vpop.eup %3397 }
 0x4a2   :  { %v3400_v16 = vpop.eup %3399  ;;  %v1298_v7 = vadd.f32 1.0, %v3398_v18 }
 0x4a3   :  { %v1304_v22 = vadd.f32 1.0, %v3400_v16  ;;  %v3402_v20 = vpop.eup %3401 }
 0x4a4   :  { %3405 = vrcp.f32 %v1298_v7  ;;  %v3404_v57 = vpop.eup %3403  ;;  %v1311_v6 = vadd.f32 1.0, %v3402_v20 }
 0x4a5   :  { %3407 = vrcp.f32 %v1304_v22 }
 0x4a6   :  { %3409 = vrcp.f32 %v1311_v6 }
 0x4ae   :  { %v3406_v29 = vpop.eup %3405 }
 0x4af   :  { %v3408_v4 = vpop.eup %3407  ;;  %v1315_v24 = vmul.f32 %v3406_v29, %v3404_v57 }
 0x4b0   :  { %v1314_v8 = vmul.f32 %v3408_v4, %v4184_v17  ;;  %v3410_v10 = vpop.eup %3409  ;;  %v4260_v17 = vld [vmem:[%s4890_s2 + $0x44] ss:$16 sps:$4 sm:$0xff]  }
 0x4b2   :  { %v4231_v25 = vadd.f32 %v1315_v24, %v1314_v8 }
 0x4b4   :  { %3411 = vtanh.f32 %v4231_v25 }
 0x4be   :  { %v3412_v13 = vpop.eup %3411 }
 0x4bf   :  { %v1318_v3 = vmul.f32 %v3412_v13, %v3410_v10 }
 0x4c1   :  { %v1326_v54 = vpack.c.bf16 %v1318_v3, %v1318_v3 }
 0x4c3   :  { %1360 = vmatmul.mubr.bf16.vlgmr.msra.gmra.mrb[12].mxu0 %v1326_v54  ;;  %1401 = vmatmul.mubr.bf16.vlgmr.msra.gmra.mrb[52].mxu1 %v1326_v54 }
 0x4c4   :  { %1446 = vmatpush1.bf16.msra.mxu0 %v4237_v14  ;;  %1487 = vmatpush1.bf16.msra.mxu1 %v3908_v27 }
 0x4c5   :  { %1447 = vmatprep.subr.bf16.mxu0 %v4244_v15  ;;  %1488 = vmatprep.subr.bf16.mxu1 %v3914_v28 }
 0x4c6   :  { %1477 = vmatprep.mubr.bf16.mxu0 %v4916_v19  ;;  %1518 = vmatprep.mubr.bf16.mxu1 %v4916_v19 }
 0x4c8   :  { %1448 = vmatpush1.bf16.msra.mxu0 %v4253_v12  ;;  %1489 = vmatpush1.bf16.msra.mxu1 %v3921_v32 }
 0x4c9   :  { %1449 = vmatprep.subr.bf16.mxu0 %v4260_v17  ;;  %1490 = vmatprep.subr.bf16.mxu1 %v3928_v33 }
 0x4cc   :  { %1450 = vmatpush1.bf16.msra.mxu0 %v4267_v5  ;;  %1491 = vmatpush1.bf16.msra.mxu1 %v3934_v36 }
 0x4cd   :  { %1451 = vmatprep.subr.bf16.mxu0 %v4274_v55  ;;  %1492 = vmatprep.subr.bf16.mxu1 %v3940_v37 }
 0x4d0   :  { %1452 = vmatpush1.bf16.msra.mxu0 %v4281_v62  ;;  %1493 = vmatpush1.bf16.msra.mxu1 %v3946_v40 }
 0x4d1   :  { %1453 = vmatprep.subr.bf16.mxu0 %v4288_v23  ;;  %1494 = vmatprep.subr.bf16.mxu1 %v3952_v41 }
 0x4d4   :  { %1454 = vmatpush1.bf16.msra.mxu0 %v4295_v31  ;;  %1495 = vmatpush1.bf16.msra.mxu1 %v3958_v43 }
 0x4d5   :  { %1455 = vmatprep.subr.bf16.mxu0 %v4302_v34  ;;  %1496 = vmatprep.subr.bf16.mxu1 %v3964_v45 }
 0x4d8   :  { %1456 = vmatpush1.bf16.msra.mxu0 %v4309_v35  ;;  %1497 = vmatpush1.bf16.msra.mxu1 %v3970_v46 }
 0x4d9   :  { %1457 = vmatprep.subr.bf16.mxu0 %v4316_v38  ;;  %1498 = vmatprep.subr.bf16.mxu1 %v3976_v47 }
 0x4dc   :  { %1458 = vmatpush1.bf16.msra.mxu0 %v3769_v58  ;;  %1499 = vmatpush1.bf16.msra.mxu1 %v3982_v49 }
 0x4dd   :  { %1459 = vmatprep.subr.bf16.mxu0 %v3778_v60  ;;  %1500 = vmatprep.subr.bf16.mxu1 %v3988_v51 }
 0x4e0   :  { %1460 = vmatpush1.bf16.msra.mxu0 %v3793_v63  ;;  %1501 = vmatpush1.bf16.msra.mxu1 %v3994_v52 }
 0x4e1   :  { %1563 = vmatprep.subr.bf16.mxu0 %v4222_v30  ;;  %1604 = vmatprep.subr.bf16.mxu1 %v3902_v26 }
 0x596   :  { %v1361_v39 = vpop.f32.mrb[12].mxu0  ;;  %v1402_v42 = vpop.f32.mrb[52].mxu1 }
 0x597   :  { %v1409_v48 = vadd.f32 %v1361_v39, %v4921_v44  ;;  %v1411_v58 = vadd.f32 %v1402_v42, %v4922_v50  ;;  %v1363_v53 = vpop.f32.mrb[13].mxu0  ;;  %v1404_v56 = vpop.f32.mrb[53].mxu1 }
 0x598   :  { %v1410_v60 = vadd.f32 %v1363_v53, %v4923_v9  ;;  %v1412_v0 = vadd.f32 %v1404_v56, %v4924_v61  ;;  %v1365_v1 = vpop.f32.mrb[14].mxu0  ;;  %v1406_v63 = vpop.f32.mrb[54].mxu1 }
 0x599   :  { %v2537_v2 = vmul.f32 -1.442695, %v1409_v48  ;;  %v1366_v21 = vpop.f32.mrb[15].mxu0  ;;  %v1407_v59 = vpop.f32.mrb[55].mxu1 }
 0x59a   :  { %v2538_v11 = vmul.f32 -1.442695, %v1410_v60  ;;  %v2539_v18 = vmul.f32 -1.442695, %v1412_v0 }
 0x59b   :  { %3413 = vpow2.f32 %v2537_v2 }
 0x59c   :  { %3415 = vpow2.f32 %v2538_v11 }
 0x59d   :  { %3417 = vpow2.f32 %v2539_v18 }
 0x59e   :  { %3419 = vtanh.f32 %v1411_v58 }
 0x5a5   :  { %v3414_v16 = vpop.eup %3413 }
 0x5a6   :  { %v3416_v7 = vpop.eup %3415  ;;  %v1416_v22 = vadd.f32 1.0, %v3414_v16 }
 0x5a7   :  { %v1422_v20 = vadd.f32 1.0, %v3416_v7  ;;  %v3418_v57 = vpop.eup %3417 }
 0x5a8   :  { %3421 = vrcp.f32 %v1416_v22  ;;  %v3420_v29 = vpop.eup %3419  ;;  %v1429_v8 = vadd.f32 1.0, %v3418_v57  ;;  %v3488_v57 = vld [vmem:[%s4890_s2 + $0x2c] ss:$16 sps:$4 sm:$0xff]  }
 0x5a9   :  { %3423 = vrcp.f32 %v1422_v20  ;;  %v3487_v20 = vld [vmem:[%s4890_s2 + $0x8] ss:$16 sps:$4 sm:$0xff]  }
 0x5aa   :  { %3425 = vrcp.f32 %v1429_v8  ;;  %v4930_v8 = vld [vmem:[#allocation19_spill] sm:$0xff] }
 0x5b2   :  { %v3422_v4 = vpop.eup %3421 }
 0x5b3   :  { %v3424_v24 = vpop.eup %3423  ;;  %v1433_v6 = vmul.f32 %v3422_v4, %v3420_v29 }
 0x5b4   :  { %v1432_v10 = vmul.f32 %v3424_v24, %v4231_v25  ;;  %v3426_v3 = vpop.eup %3425  ;;  %v4929_v24 = vld [vmem:[#allocation9_spill] sm:$0xff] }
 0x5b6   :  { %v4333_v13 = vadd.f32 %v1433_v6, %v1432_v10 }
 0x5b8   :  { %3427 = vtanh.f32 %v4333_v13 }
 0x5c2   :  { %v3428_v54 = vpop.eup %3427 }
 0x5c3   :  { %v1436_v39 = vmul.f32 %v3428_v54, %v3426_v3  ;;  %v4931_v54 = vld [vmem:[#allocation10_spill] sm:$0xff] }
 0x5c5   :  { %v1444_v42 = vpack.c.bf16 %v1436_v39, %v1436_v39 }
 0x5c7   :  { %1478 = vmatmul.mubr.bf16.vlgmr.msra.gmra.mrb[16].mxu0 %v1444_v42  ;;  %1519 = vmatmul.mubr.bf16.vlgmr.msra.gmra.mrb[56].mxu1 %v1444_v42  ;;  %v4932_v42 = vld [vmem:[#allocation20_spill] sm:$0xff] }
 0x5c8   :  { %1564 = vmatpush1.bf16.msra.mxu0 %v4237_v14  ;;  %1605 = vmatpush1.bf16.msra.mxu1 %v3908_v27  ;;  %v4365_v27 = vld [vmem:[%s4890_s2 + $0xc0] ss:$16 sps:$4 sm:$0xff]  }
 0x5c9   :  { %1565 = vmatprep.subr.bf16.mxu0 %v4244_v15  ;;  %1606 = vmatprep.subr.bf16.mxu1 %v3914_v28  ;;  %v4372_v28 = vld [vmem:[%s4890_s2 + $0xe4] ss:$16 sps:$4 sm:$0xff]  }
 0x5ca   :  { %1595 = vmatprep.mubr.bf16.mxu0 %v4916_v19  ;;  %1636 = vmatprep.mubr.bf16.mxu1 %v4916_v19 }
 0x5cc   :  { %1566 = vmatpush1.bf16.msra.mxu0 %v4253_v12  ;;  %1607 = vmatpush1.bf16.msra.mxu1 %v3921_v32  ;;  %v4379_v32 = vld [vmem:[%s4890_s2 + $0xe0] ss:$16 sps:$4 sm:$0xff]  }
 0x5cd   :  { %1567 = vmatprep.subr.bf16.mxu0 %v4260_v17  ;;  %1608 = vmatprep.subr.bf16.mxu1 %v3928_v33 }
 0x5d0   :  { %1568 = vmatpush1.bf16.msra.mxu0 %v4267_v5  ;;  %1609 = vmatpush1.bf16.msra.mxu1 %v3934_v36 }
 0x5d1   :  { %1569 = vmatprep.subr.bf16.mxu0 %v4274_v55  ;;  %1610 = vmatprep.subr.bf16.mxu1 %v3940_v37  ;;  %v4925_v37 = vld [vmem:[#allocation7_spill] sm:$0xff] }
 0x5d4   :  { %1570 = vmatpush1.bf16.msra.mxu0 %v4281_v62  ;;  %1611 = vmatpush1.bf16.msra.mxu1 %v3946_v40 }
 0x5d5   :  { %1571 = vmatprep.subr.bf16.mxu0 %v4288_v23  ;;  %1612 = vmatprep.subr.bf16.mxu1 %v3952_v41  ;;  %v4926_v41 = vld [vmem:[#allocation17_spill] sm:$0xff] }
 0x5d8   :  { %1572 = vmatpush1.bf16.msra.mxu0 %v4295_v31  ;;  %1613 = vmatpush1.bf16.msra.mxu1 %v3958_v43 }
 0x5d9   :  { %1573 = vmatprep.subr.bf16.mxu0 %v4302_v34  ;;  %1614 = vmatprep.subr.bf16.mxu1 %v3964_v45 }
 0x5dc   :  { %1574 = vmatpush1.bf16.msra.mxu0 %v4309_v35  ;;  %1615 = vmatpush1.bf16.msra.mxu1 %v3970_v46 }
 0x5dd   :  { %1575 = vmatprep.subr.bf16.mxu0 %v4316_v38  ;;  %1616 = vmatprep.subr.bf16.mxu1 %v3976_v47  ;;  %v4927_v47 = vld [vmem:[#allocation8_spill] sm:$0xff] }
 0x5e0   :  { %1576 = vmatpush1.bf16.msra.mxu0 %v4365_v27  ;;  %1617 = vmatpush1.bf16.msra.mxu1 %v3982_v49 }
 0x5e1   :  { %1577 = vmatprep.subr.bf16.mxu0 %v4372_v28  ;;  %1618 = vmatprep.subr.bf16.mxu1 %v3988_v51  ;;  %v4928_v51 = vld [vmem:[#allocation18_spill] sm:$0xff] }
 0x5e4   :  { %1578 = vmatpush1.bf16.msra.mxu0 %v4379_v32  ;;  %1619 = vmatpush1.bf16.msra.mxu1 %v3994_v52 }
 0x5e5   :  { %1680 = vmatprep.subr.bf16.mxu0 %v4222_v30  ;;  %1721 = vmatprep.subr.bf16.mxu1 %v3902_v26 }
 0x69a   :  { %v1479_v33 = vpop.f32.mrb[16].mxu0  ;;  %v1520_v36 = vpop.f32.mrb[56].mxu1 }
 0x69b   :  { %v1527_v40 = vadd.f32 %v1479_v33, %v4925_v37  ;;  %v1529_v43 = vadd.f32 %v1520_v36, %v4926_v41  ;;  %v1481_v45 = vpop.f32.mrb[17].mxu0  ;;  %v1522_v46 = vpop.f32.mrb[57].mxu1 }
 0x69c   :  { %v1528_v49 = vadd.f32 %v1481_v45, %v4927_v47  ;;  %v1530_v25 = vadd.f32 %v1522_v46, %v4928_v51  ;;  %v1483_v44 = vpop.f32.mrb[18].mxu0  ;;  %v1524_v48 = vpop.f32.mrb[58].mxu1 }
 0x69d   :  { %v2540_v50 = vmul.f32 -1.442695, %v1527_v40  ;;  %v1484_v52 = vpop.f32.mrb[19].mxu0  ;;  %v1525_v58 = vpop.f32.mrb[59].mxu1 }
 0x69e   :  { %v2541_v30 = vmul.f32 -1.442695, %v1528_v49  ;;  %v2542_v26 = vmul.f32 -1.442695, %v1530_v25 }
 0x69f   :  { %3429 = vpow2.f32 %v2540_v50 }
 0x6a0   :  { %3431 = vpow2.f32 %v2541_v30 }
 0x6a1   :  { %3433 = vpow2.f32 %v2542_v26 }
 0x6a2   :  { %3435 = vtanh.f32 %v1529_v43 }
 0x6a9   :  { %v3430_v53 = vpop.eup %3429 }
 0x6aa   :  { %v3432_v56 = vpop.eup %3431  ;;  %v1534_v9 = vadd.f32 1.0, %v3430_v53 }
 0x6ab   :  { %v1540_v60 = vadd.f32 1.0, %v3432_v56  ;;  %v3434_v61 = vpop.eup %3433 }
 0x6ac   :  { %3437 = vrcp.f32 %v1534_v9  ;;  %v3436_v0 = vpop.eup %3435  ;;  %v1547_v21 = vadd.f32 1.0, %v3434_v61  ;;  %v1781_v9 = vld [vmem:[%s4892_s4] sm:$0xff] }
 0x6ad   :  { %3439 = vrcp.f32 %v1540_v60  ;;  %v1782_v60 = vld [vmem:[%s4892_s4 + $0x8] sm:$0xff] }
 0x6ae   :  { %3441 = vrcp.f32 %v1547_v21  ;;  %v3009_v61 = vpack.c.bf16 %v1782_v60, %v1781_v9  ;;  %v1785_v21 = vld [vmem:[%s4892_s4 + $0x20] sm:$0xff]  ;;  %v2557_v60 = vld [vmem:[%s4892_s4 + $0xc8] sm:$0xff] }
 0x6af   :  { %v2556_v9 = vld [vmem:[%s4892_s4 + $0xc0] sm:$0xff] }
 0x6b6   :  { %v3438_v1 = vpop.eup %3437 }
 0x6b7   :  { %v3440_v63 = vpop.eup %3439  ;;  %v1551_v2 = vmul.f32 %v3438_v1, %v3436_v0  ;;  %v3503_v0 = vmov 0.0|0.0   ;;  %v1783_v1 = vld [vmem:[%s4892_s4 + $0x10] sm:$0xff] }
 0x6b8   :  { %v1550_v59 = vmul.f32 %v3440_v63, %v4333_v13  ;;  %v3442_v18 = vpop.eup %3441  ;;  %v1784_v63 = vld [vmem:[%s4892_s4 + $0x18] sm:$0xff] }
 0x6ba   :  { %v4390_v11 = vadd.f32 %v1551_v2, %v1550_v59  ;;  %v3012_v2 = vpack.c.bf16 %v1784_v63, %v1783_v1  ;;  %v1786_v59 = vld [vmem:[%s4892_s4 + $0x28] sm:$0xff]  ;;  %v2558_v1 = vld [vmem:[%s4892_s4 + $0xd0] sm:$0xff]  ;;  %v2559_v63 = vld [vmem:[%s4892_s4 + $0xd8] sm:$0xff] }
 0x6bc   :  { %3443 = vtanh.f32 %v4390_v11 }
 0x6c6   :  { %v3444_v16 = vpop.eup %3443 }
 0x6c7   :  { %v1554_v7 = vmul.f32 %v3444_v16, %v3442_v18  ;;  %v1787_v18 = vld [vmem:[%s4892_s4 + $0x30] sm:$0xff]  ;;  %v1788_v16 = vld [vmem:[%s4892_s4 + $0x38] sm:$0xff] }
 0x6c9   :  { %v1562_v22 = vpack.c.bf16 %v1554_v7, %v1554_v7  ;;  %v3018_v7 = vpack.c.bf16 %v1788_v16, %v1787_v18  ;;  %v2562_v18 = vld [vmem:[%s4892_s4 + $0xf0] sm:$0xff]  ;;  %v2563_v16 = vld [vmem:[%s4892_s4 + $0xf8] sm:$0xff] }
 0x6cb   :  { %1596 = vmatmul.mubr.bf16.vlgmr.msra.gmra.mrb[20].mxu0 %v1562_v22  ;;  %1637 = vmatmul.mubr.bf16.vlgmr.msra.gmra.mrb[60].mxu1 %v1562_v22  ;;  %v1789_v22 = vld [vmem:[%s4892_s4 + $0x40] sm:$0xff] }
 0x6cc   :  { %1681 = vmatpush1.bf16.msra.mxu0 %v4237_v14  ;;  %1722 = vmatpush1.bf16.msra.mxu1 %v3487_v20  ;;  %v3489_v14 = vld [vmem:[%s4890_s2 + $0x28] ss:$16 sps:$4 sm:$0xff]  }
 0x6cd   :  { %1682 = vmatprep.subr.bf16.mxu0 %v4244_v15  ;;  %1723 = vmatprep.subr.bf16.mxu1 %v3488_v57  ;;  %v3490_v15 = vld [vmem:[%s4890_s2 + $0x4c] ss:$16 sps:$4 sm:$0xff]  }
 0x6ce   :  { %1712 = vmatprep.mubr.bf16.mxu0 %v4916_v19  ;;  %1753 = vmatprep.mubr.bf16.mxu1 %v4916_v19  ;;  %v3491_v19 = vld [vmem:[%s4890_s2 + $0x48] ss:$16 sps:$4 sm:$0xff]  }
 0x6cf   :  { %v1790_v20 = vld [vmem:[%s4892_s4 + $0x48] sm:$0xff] }
 0x6d0   :  { %1683 = vmatpush1.bf16.msra.mxu0 %v4253_v12  ;;  %1724 = vmatpush1.bf16.msra.mxu1 %v3489_v14  ;;  %v3492_v12 = vld [vmem:[%s4890_s2 + $0x6c] ss:$16 sps:$4 sm:$0xff]   ;;  %v3021_v57 = vpack.c.bf16 %v1790_v20, %v1789_v22  ;;  %v1791_v14 = vld [vmem:[%s4892_s4 + $0x50] sm:$0xff]  ;;  %v2564_v22 = vld [vmem:[%s4892_s4 + $0x100] sm:$0xff] }
 0x6d1   :  { %1684 = vmatprep.subr.bf16.mxu0 %v4260_v17  ;;  %1725 = vmatprep.subr.bf16.mxu1 %v3490_v15  ;;  %v3493_v17 = vld [vmem:[%s4890_s2 + $0x68] ss:$16 sps:$4 sm:$0xff]  }
 0x6d2   :  { %v1792_v15 = vld [vmem:[%s4892_s4 + $0x58] sm:$0xff]  ;;  %v2565_v20 = vld [vmem:[%s4892_s4 + $0x108] sm:$0xff] }
 0x6d4   :  { %1685 = vmatpush1.bf16.msra.mxu0 %v4267_v5  ;;  %1726 = vmatpush1.bf16.msra.mxu1 %v3491_v19  ;;  %v3494_v5 = vld [vmem:[%s4890_s2 + $0x8c] ss:$16 sps:$4 sm:$0xff]   ;;  %v3024_v19 = vpack.c.bf16 %v1792_v15, %v1791_v14  ;;  %v2566_v15 = vld [vmem:[%s4892_s4 + $0x110] sm:$0xff] }
 0x6d5   :  { %1686 = vmatprep.subr.bf16.mxu0 %v4274_v55  ;;  %1727 = vmatprep.subr.bf16.mxu1 %v3492_v12  ;;  %v3495_v55 = vld [vmem:[%s4890_s2 + $0x88] ss:$16 sps:$4 sm:$0xff]   ;;  %v1793_v12 = vld [vmem:[%s4892_s4 + $0x60] sm:$0xff] }
 0x6d8   :  { %1687 = vmatpush1.bf16.msra.mxu0 %v4281_v62  ;;  %1728 = vmatpush1.bf16.msra.mxu1 %v3493_v17  ;;  %v3496_v62 = vld [vmem:[%s4890_s2 + $0xac] ss:$16 sps:$4 sm:$0xff]  }
 0x6d9   :  { %1688 = vmatprep.subr.bf16.mxu0 %v4288_v23  ;;  %1729 = vmatprep.subr.bf16.mxu1 %v3494_v5  ;;  %v3497_v23 = vld [vmem:[%s4890_s2 + $0xa8] ss:$16 sps:$4 sm:$0xff]  }
 0x6da   :  { %v1794_v17 = vld [vmem:[%s4892_s4 + $0x68] sm:$0xff] }
 0x6db   :  { %v3027_v5 = vpack.c.bf16 %v1794_v17, %v1793_v12  ;;  %v2568_v17 = vld [vmem:[%s4892_s4 + $0x120] sm:$0xff] }
 0x6dc   :  { %1689 = vmatpush1.bf16.msra.mxu0 %v4295_v31  ;;  %1730 = vmatpush1.bf16.msra.mxu1 %v3495_v55  ;;  %v3498_v31 = vld [vmem:[%s4890_s2 + $0xcc] ss:$16 sps:$4 sm:$0xff]   ;;  %v1795_v55 = vld [vmem:[%s4892_s4 + $0x70] sm:$0xff] }
 0x6dd   :  { %1690 = vmatprep.subr.bf16.mxu0 %v4302_v34  ;;  %1731 = vmatprep.subr.bf16.mxu1 %v3496_v62  ;;  %v3499_v34 = vld [vmem:[%s4890_s2 + $0xc8] ss:$16 sps:$4 sm:$0xff]  }
 0x6de   :  { %v1796_v62 = vld [vmem:[%s4892_s4 + $0x78] sm:$0xff] }
 0x6e0   :  { %1691 = vmatpush1.bf16.msra.mxu0 %v4309_v35  ;;  %1732 = vmatpush1.bf16.msra.mxu1 %v3497_v23  ;;  %v3500_v35 = vld [vmem:[%s4890_s2 + $0xec] ss:$16 sps:$4 sm:$0xff]   ;;  %v3030_v23 = vpack.c.bf16 %v1796_v62, %v1795_v55  ;;  %v2570_v62 = vld [vmem:[%s4892_s4 + $0x130] sm:$0xff] }
 0x6e1   :  { %1692 = vmatprep.subr.bf16.mxu0 %v4316_v38  ;;  %1733 = vmatprep.subr.bf16.mxu1 %v3498_v31  ;;  %v3501_v38 = vld [vmem:[%s4890_s2 + $0xe8] ss:$16 sps:$4 sm:$0xff]   ;;  %v3505_v31 = vmov 0.0  }
 0x6e4   :  { %1693 = vmatpush1.bf16.msra.mxu0 %v4365_v27  ;;  %1734 = vmatpush1.bf16.msra.mxu1 %v3499_v34 }
 0x6e5   :  { %1694 = vmatprep.subr.bf16.mxu0 %v4372_v28  ;;  %1735 = vmatprep.subr.bf16.mxu1 %v3500_v35 }
 0x6e8   :  { %1695 = vmatpush1.bf16.msra.mxu0 %v4379_v32  ;;  %1736 = vmatpush1.bf16.msra.mxu1 %v3501_v38  ;;  %v4933_v38 = vld [vmem:[#allocation11_spill] sm:$0xff] }
 0x6e9   :  { %3008 = vmatprep.subr.bf16.mxu0 %v3503_v0 }
 0x79e   :  { %v1597_v29 = vpop.f32.mrb[20].mxu0  ;;  %v1638_v4 = vpop.f32.mrb[60].mxu1 }
 0x79f   :  { %v1645_v6 = vadd.f32 %v1597_v29, %v4929_v24  ;;  %v1647_v10 = vadd.f32 %v1638_v4, %v4930_v8  ;;  %v1599_v13 = vpop.f32.mrb[21].mxu0  ;;  %v1640_v3 = vpop.f32.mrb[61].mxu1  ;;  %v4934_v4 = vld [vmem:[#allocation21_spill] sm:$0xff] }
 0x7a0   :  { %v1646_v39 = vadd.f32 %v1599_v13, %v4931_v54  ;;  %v1648_v27 = vadd.f32 %v1640_v3, %v4932_v42  ;;  %v1601_v28 = vpop.f32.mrb[22].mxu0  ;;  %v1642_v33 = vpop.f32.mrb[62].mxu1 }
 0x7a1   :  { %v2543_v32 = vmul.f32 -1.442695, %v1645_v6  ;;  %v1602_v36 = vpop.f32.mrb[23].mxu0  ;;  %v1643_v37 = vpop.f32.mrb[63].mxu1 }
 0x7a2   :  { %v2544_v40 = vmul.f32 -1.442695, %v1646_v39  ;;  %v2545_v41 = vmul.f32 -1.442695, %v1648_v27 }
 0x7a3   :  { %3445 = vpow2.f32 %v2543_v32 }
 0x7a4   :  { %3447 = vpow2.f32 %v2544_v40 }
 0x7a5   :  { %3449 = vpow2.f32 %v2545_v41 }
 0x7a6   :  { %3451 = vtanh.f32 %v1647_v10  ;;  %v4935_v10 = vld [vmem:[#allocation12_spill] sm:$0xff] }
 0x7ad   :  { %v3446_v43 = vpop.eup %3445 }
 0x7ae   :  { %v3448_v45 = vpop.eup %3447  ;;  %v1652_v46 = vadd.f32 1.0, %v3446_v43  ;;  %v2548_v43 = vld [vmem:[%s4892_s4 + $0x80] sm:$0xff] }
 0x7af   :  { %v1658_v47 = vadd.f32 1.0, %v3448_v45  ;;  %v3450_v49 = vpop.eup %3449  ;;  %v2549_v45 = vld [vmem:[%s4892_s4 + $0x88] sm:$0xff] }
 0x7b0   :  { %3453 = vrcp.f32 %v1652_v46  ;;  %v3452_v51 = vpop.eup %3451  ;;  %v1665_v50 = vadd.f32 1.0, %v3450_v49 }
 0x7b1   :  { %3455 = vrcp.f32 %v1658_v47 }
 0x7b2   :  { %3457 = vrcp.f32 %v1665_v50 }
 0x7ba   :  { %v3454_v25 = vpop.eup %3453 }
 0x7bb   :  { %v3456_v44 = vpop.eup %3455  ;;  %v1669_v48 = vmul.f32 %v3454_v25, %v3452_v51  ;;  %v3033_v51 = vpack.c.bf16 %v2549_v45, %v2548_v43  ;;  %v2586_v45 = vld [vmem:[%s4892_s4 + $0x1b0] sm:$0xff] }
 0x7bc   :  { %v1668_v52 = vmul.f32 %v3456_v44, %v4390_v11  ;;  %v3458_v30 = vpop.eup %3457  ;;  %v3015_v11 = vpack.c.bf16 %v1786_v59, %v1785_v21  ;;  %v2550_v44 = vld [vmem:[%s4892_s4 + $0x90] sm:$0xff]  ;;  %v2560_v21 = vld [vmem:[%s4892_s4 + $0xe0] sm:$0xff]  ;;  %v2561_v59 = vld [vmem:[%s4892_s4 + $0xe8] sm:$0xff] }
 0x7be   :  { %v4460_v58 = vadd.f32 %v1669_v48, %v1668_v52  ;;  %v2551_v48 = vld [vmem:[%s4892_s4 + $0x98] sm:$0xff]  ;;  %v2552_v52 = vld [vmem:[%s4892_s4 + $0xa0] sm:$0xff] }
 0x7bf   :  { %v3036_v50 = vpack.c.bf16 %v2551_v48, %v2550_v44  ;;  %v2590_v48 = vld [vmem:[%s4892_s4 + $0x1d0] sm:$0xff] }
 0x7c0   :  { %3459 = vtanh.f32 %v4460_v58 }
 0x7ca   :  { %v3460_v26 = vpop.eup %3459 }
 0x7cb   :  { %v1672_v53 = vmul.f32 %v3460_v26, %v3458_v30  ;;  %v2554_v26 = vld [vmem:[%s4892_s4 + $0xb0] sm:$0xff] }
 0x7cd   :  { %v1679_v56 = vpack.c.bf16 %v1672_v53, %v1672_v53  ;;  %v2555_v53 = vld [vmem:[%s4892_s4 + $0xb8] sm:$0xff] }
 0x7cf   :  { %1713 = vmatmul.mubr.bf16.vlgmr.msra.gmra.mrb[24].mxu0 %v1679_v56  ;;  %1754 = vmatmul.mubr.bf16.vlgmr.msra.gmra.mrb[64].mxu1 %v1679_v56  ;;  %v3042_v56 = vpack.c.bf16 %v2555_v53, %v2554_v26  ;;  %v2594_v53 = vld [vmem:[%s4892_s4 + $0x1f0] sm:$0xff] }
 0x7d0   :  { %3010 = vmatpush3.bf16.msra.mxu0 %v3009_v61  ;;  %2795 = vmatprep.mubr.msk.f32.mxu0 %vm3504_vm0, %v3505_v31  ;;  %v3045_v61 = vpack.c.bf16 %v2557_v60, %v2556_v9  ;;  %v2596_v60 = vld [vmem:[%s4892_s4 + $0x200] sm:$0xff] }
 0x7d1   :  { %3011 = vmatprep.subr.bf16.mxu0 %v3503_v0 }
 0x7d4   :  { %3013 = vmatpush3.bf16.msra.mxu0 %v3012_v2  ;;  %v3048_v2 = vpack.c.bf16 %v2559_v63, %v2558_v1 }
 0x7d5   :  { %3014 = vmatprep.subr.bf16.mxu0 %v3503_v0 }
 0x7d8   :  { %3016 = vmatpush3.bf16.msra.mxu0 %v3015_v11  ;;  %v3051_v11 = vpack.c.bf16 %v2561_v59, %v2560_v21  ;;  %v2599_v21 = vld [vmem:[%s4892_s4 + $0x218] sm:$0xff] }
 0x7d9   :  { %3017 = vmatprep.subr.bf16.mxu0 %v3503_v0 }
 0x7dc   :  { %3019 = vmatpush3.bf16.msra.mxu0 %v3018_v7  ;;  %v3054_v7 = vpack.c.bf16 %v2563_v16, %v2562_v18  ;;  %v2601_v18 = vld [vmem:[%s4892_s4 + $0x228] sm:$0xff] }
 0x7dd   :  { %3020 = vmatprep.subr.bf16.mxu0 %v3503_v0 }
 0x7e0   :  { %3022 = vmatpush3.bf16.msra.mxu0 %v3021_v57  ;;  %v3057_v57 = vpack.c.bf16 %v2565_v20, %v2564_v22  ;;  %v2603_v22 = vld [vmem:[%s4892_s4 + $0x238] sm:$0xff] }
 0x7e1   :  { %3023 = vmatprep.subr.bf16.mxu0 %v3503_v0 }
 0x7e4   :  { %3025 = vmatpush3.bf16.msra.mxu0 %v3024_v19  ;;  %v2567_v19 = vld [vmem:[%s4892_s4 + $0x118] sm:$0xff] }
 0x7e5   :  { %3026 = vmatprep.subr.bf16.mxu0 %v3503_v0  ;;  %v3060_v12 = vpack.c.bf16 %v2567_v19, %v2566_v15  ;;  %v2606_v19 = vld [vmem:[%s4892_s4 + $0x250] sm:$0xff] }
 0x7e8   :  { %3028 = vmatpush3.bf16.msra.mxu0 %v3027_v5  ;;  %v2569_v5 = vld [vmem:[%s4892_s4 + $0x128] sm:$0xff] }
 0x7e9   :  { %3029 = vmatprep.subr.bf16.mxu0 %v3503_v0  ;;  %v3063_v55 = vpack.c.bf16 %v2569_v5, %v2568_v17  ;;  %v2608_v5 = vld [vmem:[%s4892_s4 + $0x260] sm:$0xff] }
 0x7ec   :  { %3031 = vmatpush3.bf16.msra.mxu0 %v3030_v23  ;;  %v2571_v23 = vld [vmem:[%s4892_s4 + $0x138] sm:$0xff] }
 0x7ed   :  { %3032 = vmatprep.subr.bf16.mxu0 %v3503_v0 }
 0x8a2   :  { %v1714_v34 = vpop.f32.mrb[24].mxu0  ;;  %v1755_v35 = vpop.f32.mrb[64].mxu1 }
 0x8a3   :  { %v1761_v29 = vadd.f32 %v1714_v34, %v4933_v38  ;;  %v1763_v24 = vadd.f32 %v1755_v35, %v4934_v4  ;;  %v1716_v6 = vpop.f32.mrb[25].mxu0  ;;  %v1757_v8 = vpop.f32.mrb[65].mxu1  ;;  %v3066_v34 = vpack.c.bf16 %v2571_v23, %v2570_v62  ;;  %v2572_v35 = vld [vmem:[%s4892_s4 + $0x140] sm:$0xff]  ;;  %v2573_v38 = vld [vmem:[%s4892_s4 + $0x148] sm:$0xff]  ;;  %v2574_v4 = vld [vmem:[%s4892_s4 + $0x150] sm:$0xff] }
 0x8a4   :  { %v1762_v13 = vadd.f32 %v1716_v6, %v4935_v10  ;;  %v1718_v3 = vpop.f32.mrb[26].mxu0  ;;  %v1758_v54 = vpop.f32.mrb[66].mxu1  ;;  %v2576_v8 = vld [vmem:[%s4892_s4 + $0x160] sm:$0xff]  ;;  %v2577_v10 = vld [vmem:[%s4892_s4 + $0x168] sm:$0xff]  ;;  %v2610_v23 = vld [vmem:[%s4892_s4 + $0x270] sm:$0xff] }
 0x8a5   :  { %v2546_v39 = vmul.f32 -1.442695, %v1761_v29  ;;  %v1719_v42 = vpop.f32.mrb[27].mxu0  ;;  %v1759_v27 = vpop.f32.mrb[67].mxu1  ;;  %v3069_v29 = vpack.c.bf16 %v2573_v38, %v2572_v35  ;;  %v2578_v3 = vld [vmem:[%s4892_s4 + $0x170] sm:$0xff]  ;;  %v2579_v54 = vld [vmem:[%s4892_s4 + $0x178] sm:$0xff] }
 0x8a6   :  { %v2547_v28 = vmul.f32 -1.442695, %v1762_v13  ;;  %v3075_v13 = vpack.c.bf16 %v2577_v10, %v2576_v8  ;;  %v2580_v42 = vld [vmem:[%s4892_s4 + $0x180] sm:$0xff]  ;;  %v2581_v27 = vld [vmem:[%s4892_s4 + $0x188] sm:$0xff]  ;;  %v2615_v8 = vld [vmem:[%s4892_s4 + $0x298] sm:$0xff] }
 0x8a7   :  { %3461 = vpow2.f32 %v2546_v39  ;;  %v3078_v39 = vpack.c.bf16 %v2579_v54, %v2578_v3  ;;  %v2612_v38 = vld [vmem:[%s4892_s4 + $0x280] sm:$0xff]  ;;  %v2617_v3 = vld [vmem:[%s4892_s4 + $0x2a8] sm:$0xff] }
 0x8a8   :  { %3463 = vpow2.f32 %v2547_v28  ;;  %v3081_v28 = vpack.c.bf16 %v2581_v27, %v2580_v42  ;;  %v2619_v42 = vld [vmem:[%s4892_s4 + $0x2b8] sm:$0xff] }
 0x8a9   :  { %3465 = vtanh.f32 %v1763_v24  ;;  %v2575_v24 = vld [vmem:[%s4892_s4 + $0x158] sm:$0xff] }
 0x8aa   :  { %v3072_v6 = vpack.c.bf16 %v2575_v24, %v2574_v4 }
 0x8b1   :  { %v3462_v33 = vpop.eup %3461 }
 0x8b2   :  { %v3464_v32 = vpop.eup %3463  ;;  %v1767_v36 = vadd.f32 1.0, %v3462_v33 }
 0x8b3   :  { %v1773_v37 = vadd.f32 1.0, %v3464_v32  ;;  %v3466_v40 = vpop.eup %3465  ;;  %v2582_v32 = vld [vmem:[%s4892_s4 + $0x190] sm:$0xff] }
 0x8b4   :  { %3467 = vrcp.f32 %v1767_v36  ;;  %v2583_v36 = vld [vmem:[%s4892_s4 + $0x198] sm:$0xff] }
 0x8b5   :  { %3469 = vrcp.f32 %v1773_v37  ;;  %v3084_v37 = vpack.c.bf16 %v2583_v36, %v2582_v32  ;;  %v2622_v36 = vld [vmem:[%s4892_s4 + $0x2d0] sm:$0xff] }
 0x8be   :  { %v3468_v41 = vpop.eup %3467 }
 0x8bf   :  { %v3470_v46 = vpop.eup %3469  ;;  %v1778_v47 = vmul.f32 %v3468_v41, %v3466_v40  ;;  %v2584_v40 = vld [vmem:[%s4892_s4 + $0x1a0] sm:$0xff]  ;;  %v2585_v41 = vld [vmem:[%s4892_s4 + $0x1a8] sm:$0xff] }
 0x8c0   :  { %v1777_v49 = vmul.f32 %v3470_v46, %v4460_v58  ;;  %v2553_v58 = vld [vmem:[%s4892_s4 + $0xa8] sm:$0xff]  ;;  %v3087_v43 = vpack.c.bf16 %v2585_v41, %v2584_v40  ;;  %v2587_v46 = vld [vmem:[%s4892_s4 + $0x1b8] sm:$0xff]  ;;  %v2624_v41 = vld [vmem:[%s4892_s4 + $0x2e0] sm:$0xff] }
 0x8c1   :  { %v3039_v30 = vpack.c.bf16 %v2553_v58, %v2552_v52  ;;  %v2592_v58 = vld [vmem:[%s4892_s4 + $0x1e0] sm:$0xff] }
 0x8c2   :  { %v4532_v25 = vadd.f32 %v1778_v47, %v1777_v49  ;;  %v3090_v47 = vpack.c.bf16 %v2587_v46, %v2586_v45  ;;  %v2588_v49 = vld [vmem:[%s4892_s4 + $0x1c0] sm:$0xff]  ;;  %v2626_v46 = vld [vmem:[%s4892_s4 + $0x2f0] sm:$0xff] }
 0x8c4   :  { %2796 = vmatmul.mubr.f32.vlgmr.msra.gmra.mrb[28].mxu0 %v4532_v25  ;;  %v1886_v14 = vrot.slane %v4532_v25, 1  ;;  %v1976_v33 = vrot.slane %v4532_v25, 2  ;;  %v2066_v63 = vrot.slane %v4532_v25, 3  ;;  %v2156_v24 = vrot.slane %v4532_v25, 4 }
 0x8c5   :  { %3034 = vmatpush3.bf16.msra.mxu0 %v3033_v51  ;;  %2830 = vmatprep.mubr.msk.f32.mxu0 %vm3504_vm0, %v3505_v31  ;;  %v2589_v51 = vld [vmem:[%s4892_s4 + $0x1c8] sm:$0xff] }
 0x8c6   :  { %3035 = vmatprep.subr.bf16.mxu0 %v3503_v0  ;;  %v3093_v44 = vpack.c.bf16 %v2589_v51, %v2588_v49  ;;  %v2628_v51 = vld [vmem:[%s4892_s4 + $0x300] sm:$0xff] }
 0x8c9   :  { %3037 = vmatpush3.bf16.msra.mxu0 %v3036_v50  ;;  %v2591_v50 = vld [vmem:[%s4892_s4 + $0x1d8] sm:$0xff] }
 0x8ca   :  { %3038 = vmatprep.subr.bf16.mxu0 %v3503_v0  ;;  %v3096_v52 = vpack.c.bf16 %v2591_v50, %v2590_v48  ;;  %v2246_v50 = vrot.slane %v4532_v25, 5 }
 0x8cd   :  { %3040 = vmatpush3.bf16.msra.mxu0 %v3039_v30  ;;  %v2593_v30 = vld [vmem:[%s4892_s4 + $0x1e8] sm:$0xff] }
 0x8ce   :  { %3041 = vmatprep.subr.bf16.mxu0 %v3503_v0  ;;  %v3099_v26 = vpack.c.bf16 %v2593_v30, %v2592_v58  ;;  %v2631_v58 = vld [vmem:[%s4892_s4 + $0x318] sm:$0xff] }
 0x8d1   :  { %3043 = vmatpush3.bf16.msra.mxu0 %v3042_v56  ;;  %v2595_v56 = vld [vmem:[%s4892_s4 + $0x1f8] sm:$0xff] }
 0x8d2   :  { %3044 = vmatprep.subr.bf16.mxu0 %v3503_v0  ;;  %v3102_v9 = vpack.c.bf16 %v2595_v56, %v2594_v53  ;;  %v2633_v53 = vld [vmem:[%s4892_s4 + $0x328] sm:$0xff] }
 0x8d5   :  { %3046 = vmatpush3.bf16.msra.mxu0 %v3045_v61  ;;  %v2597_v61 = vld [vmem:[%s4892_s4 + $0x208] sm:$0xff] }
 0x8d6   :  { %3047 = vmatprep.subr.bf16.mxu0 %v3503_v0  ;;  %v3105_v1 = vpack.c.bf16 %v2597_v61, %v2596_v60  ;;  %v2636_v61 = vld [vmem:[%s4892_s4 + $0x340] sm:$0xff] }
 0x8d9   :  { %3049 = vmatpush3.bf16.msra.mxu0 %v3048_v2  ;;  %v2598_v2 = vld [vmem:[%s4892_s4 + $0x210] sm:$0xff] }
 0x8da   :  { %3050 = vmatprep.subr.bf16.mxu0 %v3503_v0  ;;  %v3108_v59 = vpack.c.bf16 %v2599_v21, %v2598_v2  ;;  %v2638_v2 = vld [vmem:[%s4892_s4 + $0x350] sm:$0xff]  ;;  %v2639_v21 = vld [vmem:[%s4892_s4 + $0x358] sm:$0xff] }
 0x8dd   :  { %3052 = vmatpush3.bf16.msra.mxu0 %v3051_v11  ;;  %v2600_v11 = vld [vmem:[%s4892_s4 + $0x220] sm:$0xff] }
 0x8de   :  { %3053 = vmatprep.subr.bf16.mxu0 %v3503_v0  ;;  %v3111_v16 = vpack.c.bf16 %v2601_v18, %v2600_v11  ;;  %v2640_v11 = vld [vmem:[%s4892_s4 + $0x360] sm:$0xff]  ;;  %v2641_v18 = vld [vmem:[%s4892_s4 + $0x368] sm:$0xff] }
 0x8e1   :  { %3055 = vmatpush3.bf16.msra.mxu0 %v3054_v7  ;;  %v2602_v7 = vld [vmem:[%s4892_s4 + $0x230] sm:$0xff] }
 0x8e2   :  { %3056 = vmatprep.subr.bf16.mxu0 %v3503_v0  ;;  %v3114_v20 = vpack.c.bf16 %v2603_v22, %v2602_v7  ;;  %v2642_v7 = vld [vmem:[%s4892_s4 + $0x370] sm:$0xff]  ;;  %v2643_v22 = vld [vmem:[%s4892_s4 + $0x378] sm:$0xff] }
 0x8e4   :  { %2831 = vmatmul.mubr.f32.vlgmr.msra.gmra.mrb[28].mxu0 %v1886_v14  ;;  %v2605_v14 = vld [vmem:[%s4892_s4 + $0x248] sm:$0xff] }
 0x8e5   :  { %3058 = vmatpush3.bf16.msra.mxu0 %v3057_v57  ;;  %2865 = vmatprep.mubr.msk.f32.mxu0 %vm3504_vm0, %v3505_v31  ;;  %v2604_v57 = vld [vmem:[%s4892_s4 + $0x240] sm:$0xff] }
 0x8e6   :  { %3059 = vmatprep.subr.bf16.mxu0 %v3503_v0  ;;  %v3117_v15 = vpack.c.bf16 %v2605_v14, %v2604_v57  ;;  %v2336_v57 = vrot.slane %v4532_v25, 6  ;;  %v1780_v14 = vld [vmem:[%s4893_s5] sm:$0x1] }
 0x8e9   :  { %3061 = vmatpush3.bf16.msra.mxu0 %v3060_v12  ;;  %v2607_v12 = vld [vmem:[%s4892_s4 + $0x258] sm:$0xff] }
 0x8ea   :  { %3062 = vmatprep.subr.bf16.mxu0 %v3503_v0  ;;  %v3120_v17 = vpack.c.bf16 %v2607_v12, %v2606_v19 }
 0x8ed   :  { %3064 = vmatpush3.bf16.msra.mxu0 %v3063_v55  ;;  %v2609_v55 = vld [vmem:[%s4892_s4 + $0x268] sm:$0xff] }
 0x8ee   :  { %3065 = vmatprep.subr.bf16.mxu0 %v3503_v0  ;;  %v3123_v62 = vpack.c.bf16 %v2609_v55, %v2608_v5 }
 0x8f1   :  { %3067 = vmatpush3.bf16.msra.mxu0 %v3066_v34  ;;  %v2611_v34 = vld [vmem:[%s4892_s4 + $0x278] sm:$0xff] }
 0x8f2   :  { %3068 = vmatprep.subr.bf16.mxu0 %v3503_v0  ;;  %v3126_v35 = vpack.c.bf16 %v2611_v34, %v2610_v23 }
 0x8f5   :  { %3070 = vmatpush3.bf16.msra.mxu0 %v3069_v29  ;;  %v2613_v29 = vld [vmem:[%s4892_s4 + $0x288] sm:$0xff] }
 0x8f6   :  { %3071 = vmatprep.subr.bf16.mxu0 %v3503_v0  ;;  %v3129_v4 = vpack.c.bf16 %v2613_v29, %v2612_v38 }
 0x8f9   :  { %3073 = vmatpush3.bf16.msra.mxu0 %v3072_v6  ;;  %v2614_v6 = vld [vmem:[%s4892_s4 + $0x290] sm:$0xff] }
 0x8fa   :  { %3074 = vmatprep.subr.bf16.mxu0 %v3503_v0  ;;  %v3132_v10 = vpack.c.bf16 %v2615_v8, %v2614_v6 }
 0x8fd   :  { %3076 = vmatpush3.bf16.msra.mxu0 %v3075_v13  ;;  %v2616_v13 = vld [vmem:[%s4892_s4 + $0x2a0] sm:$0xff] }
 0x8fe   :  { %3077 = vmatprep.subr.bf16.mxu0 %v3503_v0  ;;  %v3135_v54 = vpack.c.bf16 %v2617_v3, %v2616_v13 }
 0x901   :  { %3079 = vmatpush3.bf16.msra.mxu0 %v3078_v39  ;;  %v2618_v39 = vld [vmem:[%s4892_s4 + $0x2b0] sm:$0xff] }
 0x902   :  { %3080 = vmatprep.subr.bf16.mxu0 %v3503_v0  ;;  %v3138_v27 = vpack.c.bf16 %v2619_v42, %v2618_v39 }
 0x904   :  { %2866 = vmatmul.mubr.f32.vlgmr.msra.gmra.mrb[28].mxu0 %v1976_v33  ;;  %v2621_v33 = vld [vmem:[%s4892_s4 + $0x2c8] sm:$0xff] }
 0x905   :  { %3082 = vmatpush3.bf16.msra.mxu0 %v3081_v28  ;;  %2900 = vmatprep.mubr.msk.f32.mxu0 %vm3504_vm0, %v3505_v31  ;;  %v2620_v28 = vld [vmem:[%s4892_s4 + $0x2c0] sm:$0xff] }
 0x906   :  { %3083 = vmatprep.subr.bf16.mxu0 %v3503_v0  ;;  %v3141_v32 = vpack.c.bf16 %v2621_v33, %v2620_v28 }
 0x909   :  { %3085 = vmatpush3.bf16.msra.mxu0 %v3084_v37  ;;  %v2623_v37 = vld [vmem:[%s4892_s4 + $0x2d8] sm:$0xff] }
 0x90a   :  { %3086 = vmatprep.subr.bf16.mxu0 %v3503_v0  ;;  %v3144_v40 = vpack.c.bf16 %v2623_v37, %v2622_v36 }
 0x90d   :  { %3088 = vmatpush3.bf16.msra.mxu0 %v3087_v43  ;;  %v2625_v43 = vld [vmem:[%s4892_s4 + $0x2e8] sm:$0xff] }
 0x90e   :  { %3089 = vmatprep.subr.bf16.mxu0 %v3503_v0  ;;  %v3147_v45 = vpack.c.bf16 %v2625_v43, %v2624_v41 }
 0x911   :  { %3091 = vmatpush3.bf16.msra.mxu0 %v3090_v47  ;;  %v2627_v47 = vld [vmem:[%s4892_s4 + $0x2f8] sm:$0xff] }
 0x912   :  { %3092 = vmatprep.subr.bf16.mxu0 %v3503_v0  ;;  %v3150_v49 = vpack.c.bf16 %v2627_v47, %v2626_v46 }
 0x915   :  { %3094 = vmatpush3.bf16.msra.mxu0 %v3093_v44  ;;  %v2629_v44 = vld [vmem:[%s4892_s4 + $0x308] sm:$0xff] }
 0x916   :  { %3095 = vmatprep.subr.bf16.mxu0 %v3503_v0  ;;  %v3153_v48 = vpack.c.bf16 %v2629_v44, %v2628_v51 }
 0x919   :  { %3097 = vmatpush3.bf16.msra.mxu0 %v3096_v52  ;;  %v2630_v52 = vld [vmem:[%s4892_s4 + $0x310] sm:$0xff] }
 0x91a   :  { %3098 = vmatprep.subr.bf16.mxu0 %v3503_v0  ;;  %v3156_v30 = vpack.c.bf16 %v2631_v58, %v2630_v52 }
 0x91d   :  { %3100 = vmatpush3.bf16.msra.mxu0 %v3099_v26  ;;  %v2632_v26 = vld [vmem:[%s4892_s4 + $0x320] sm:$0xff] }
 0x91e   :  { %3101 = vmatprep.subr.bf16.mxu0 %v3503_v0  ;;  %v3159_v56 = vpack.c.bf16 %v2633_v53, %v2632_v26 }
 0x921   :  { %3103 = vmatpush3.bf16.msra.mxu0 %v3102_v9  ;;  %v2634_v9 = vld [vmem:[%s4892_s4 + $0x330] sm:$0xff] }
 0x922   :  { %3104 = vmatprep.subr.bf16.mxu0 %v3503_v0 }
 0x924   :  { %2901 = vmatmul.mubr.f32.vlgmr.msra.gmra.mrb[28].mxu0 %v2066_v63 }
 0x925   :  { %3106 = vmatpush3.bf16.msra.mxu0 %v3105_v1  ;;  %2935 = vmatprep.mubr.msk.f32.mxu0 %vm3504_vm0, %v3505_v31  ;;  %v2637_v1 = vld [vmem:[%s4892_s4 + $0x348] sm:$0xff] }
 0x926   :  { %3107 = vmatprep.subr.bf16.mxu0 %v3503_v0  ;;  %v3165_v63 = vpack.c.bf16 %v2637_v1, %v2636_v61 }
 0x929   :  { %3109 = vmatpush3.bf16.msra.mxu0 %v3108_v59  ;;  %v3168_v59 = vpack.c.bf16 %v2639_v21, %v2638_v2 }
 0x92a   :  { %3110 = vmatprep.subr.bf16.mxu0 %v3503_v0 }
 0x92d   :  { %3112 = vmatpush3.bf16.msra.mxu0 %v3111_v16  ;;  %v3171_v16 = vpack.c.bf16 %v2641_v18, %v2640_v11 }
 0x92e   :  { %3113 = vmatprep.subr.bf16.mxu0 %v3503_v0 }
 0x931   :  { %3115 = vmatpush3.bf16.msra.mxu0 %v3114_v20  ;;  %v3174_v20 = vpack.c.bf16 %v2643_v22, %v2642_v7 }
 0x932   :  { %3116 = vmatprep.subr.bf16.mxu0 %v3503_v0 }
 0x935   :  { %3118 = vmatpush3.bf16.msra.mxu0 %v3117_v15 }
 0x936   :  { %3119 = vmatprep.subr.bf16.mxu0 %v3503_v0 }
 0x939   :  { %3121 = vmatpush3.bf16.msra.mxu0 %v3120_v17 }
 0x93a   :  { %3122 = vmatprep.subr.bf16.mxu0 %v3503_v0 }
 0x93d   :  { %3124 = vmatpush3.bf16.msra.mxu0 %v3123_v62 }
 0x93e   :  { %3125 = vmatprep.subr.bf16.mxu0 %v3503_v0 }
 0x941   :  { %3127 = vmatpush3.bf16.msra.mxu0 %v3126_v35 }
 0x942   :  { %3128 = vmatprep.subr.bf16.mxu0 %v3503_v0 }
 0x944   :  { %2936 = vmatmul.mubr.f32.vlgmr.msra.gmra.mrb[28].mxu0 %v2156_v24 }
 0x945   :  { %3130 = vmatpush3.bf16.msra.mxu0 %v3129_v4  ;;  %2970 = vmatprep.mubr.msk.f32.mxu0 %vm3504_vm0, %v3505_v31 }
 0x946   :  { %3131 = vmatprep.subr.bf16.mxu0 %v3503_v0 }
 0x949   :  { %3133 = vmatpush3.bf16.msra.mxu0 %v3132_v10 }
 0x94a   :  { %3134 = vmatprep.subr.bf16.mxu0 %v3503_v0 }
 0x94d   :  { %3136 = vmatpush3.bf16.msra.mxu0 %v3135_v54 }
 0x94e   :  { %3137 = vmatprep.subr.bf16.mxu0 %v3503_v0 }
 0x951   :  { %3139 = vmatpush3.bf16.msra.mxu0 %v3138_v27 }
 0x952   :  { %3140 = vmatprep.subr.bf16.mxu0 %v3503_v0 }
 0x955   :  { %3142 = vmatpush3.bf16.msra.mxu0 %v3141_v32 }
 0x956   :  { %3143 = vmatprep.subr.bf16.mxu0 %v3503_v0 }
 0x959   :  { %3145 = vmatpush3.bf16.msra.mxu0 %v3144_v40 }
 0x95a   :  { %3146 = vmatprep.subr.bf16.mxu0 %v3503_v0 }
 0x95d   :  { %3148 = vmatpush3.bf16.msra.mxu0 %v3147_v45 }
 0x95e   :  { %3149 = vmatprep.subr.bf16.mxu0 %v3503_v0 }
 0x961   :  { %3151 = vmatpush3.bf16.msra.mxu0 %v3150_v49 }
 0x962   :  { %3152 = vmatprep.subr.bf16.mxu0 %v3503_v0 }
 0x964   :  { %2971 = vmatmul.mubr.f32.vlgmr.msra.gmra.mrb[28].mxu0 %v2246_v50 }
 0x965   :  { %3154 = vmatpush3.bf16.msra.mxu0 %v3153_v48  ;;  %3005 = vmatprep.mubr.msk.f32.mxu0 %vm3504_vm0, %v3505_v31  ;;  %v2635_v31 = vld [vmem:[%s4892_s4 + $0x338] sm:$0xff] }
 0x966   :  { %3155 = vmatprep.subr.bf16.mxu0 %v3503_v0  ;;  %v3162_v60 = vpack.c.bf16 %v2635_v31, %v2634_v9 }
 0x969   :  { %3157 = vmatpush3.bf16.msra.mxu0 %v3156_v30 }
 0x96a   :  { %3158 = vmatprep.subr.bf16.mxu0 %v3503_v0 }
 0x96d   :  { %3160 = vmatpush3.bf16.msra.mxu0 %v3159_v56 }
 0x96e   :  { %3161 = vmatprep.subr.bf16.mxu0 %v3503_v0 }
 0x971   :  { %3163 = vmatpush3.bf16.msra.mxu0 %v3162_v60 }
 0x972   :  { %3164 = vmatprep.subr.bf16.mxu0 %v3503_v0 }
 0x975   :  { %3166 = vmatpush3.bf16.msra.mxu0 %v3165_v63 }
 0x976   :  { %3167 = vmatprep.subr.bf16.mxu0 %v3503_v0 }
 0x979   :  { %3169 = vmatpush3.bf16.msra.mxu0 %v3168_v59 }
 0x97a   :  { %3170 = vmatprep.subr.bf16.mxu0 %v3503_v0 }
 0x97d   :  { %3172 = vmatpush3.bf16.msra.mxu0 %v3171_v16 }
 0x97e   :  { %3173 = vmatprep.subr.bf16.mxu0 %v3503_v0 }
 0x981   :  { %3175 = vmatpush3.bf16.msra.mxu0 %v3174_v20 }
 0x984   :  { %3006 = vmatmul.mubr.f32.vlgmr.msra.gmra.mrb[28].mxu0 %v2336_v57 }
 0xa57   :  { %v2404_v15 = vpop.f32.mrb[28].mxu0 }
 0xa58   :  { %v3176_v19 = vadd.f32 %v2404_v15, %v1780_v14  ;;  %v3007_v12 = vpop.f32.mrb[29].mxu0 }
 0xa5a   :  { %2409 = vst [vmem:[%s4894_s6] sm:$0x1] %v3176_v19 }

</bundles_post_ra>
